<compile_context>
chip_gen: v6e
topology: v6e:2x2x1
jax: 0.10.0
libtpu: 0.0.40
codegen_flags: <defaults>
</compile_context>

<pallas_src>
import math
import functools

import jax
import jax.numpy as jnp
from jax.experimental import pallas as pl
from jax.experimental.pallas import tpu as pltpu


# ----------------------------------------------------------------------------
# Kernel: one transformer encoder layer per grid step; activation carried in
# the (resident) output block across the layer grid axis.
# ----------------------------------------------------------------------------
def _encoder_stack_kernel(x_ref, mbias_ref,
                          wq_ref, bq_ref, wk_ref, bk_ref, wv_ref, bv_ref,
                          wo_ref, bo_ref, ln1w_ref, ln1b_ref,
                          w1_ref, b1_ref, w2_ref, b2_ref,
                          ln2w_ref, ln2b_ref,
                          o_ref, *, n_head, batch, seq):
    layer = pl.program_id(0)

    # First layer: seed the resident activation buffer with the input.
    @pl.when(layer == 0)
    def _():
        o_ref[...] = x_ref[...]

    x = o_ref[...]                                    # (B*S, D) float32
    _, D = x.shape
    Dh = D // n_head
    scale = jnp.float32(1.0 / math.sqrt(Dh))

    # --- Q/K/V projections (bf16 operands, f32 accumulation) -----------------
    xb = x.astype(jnp.bfloat16)
    q = jnp.dot(xb, wq_ref[...], preferred_element_type=jnp.float32) + bq_ref[...]
    k = jnp.dot(xb, wk_ref[...], preferred_element_type=jnp.float32) + bk_ref[...]
    v = jnp.dot(xb, wv_ref[...], preferred_element_type=jnp.float32) + bv_ref[...]

    mbias = mbias_ref[...]                            # (B, S) f32, -1e30 at pads

    # --- multi-head attention: heads batched in one contraction per batch ----
    # TODO(synk): fully-masked key rows give a uniform softmax here; PyTorch's
    # -inf key_padding_mask would give NaN in that (degenerate) case.
    ctx_rows = []
    for b in range(batch):                            # static, tiny B
        rows = slice(b * seq, (b + 1) * seq)
        qh = jnp.transpose((q[rows] * scale).reshape(seq, n_head, Dh),
                           (1, 0, 2)).astype(jnp.bfloat16)       # (H, S, Dh)
        kh = jnp.transpose(k[rows].reshape(seq, n_head, Dh),
                           (1, 0, 2)).astype(jnp.bfloat16)       # (H, S, Dh)
        vh = jnp.transpose(v[rows].reshape(seq, n_head, Dh),
                           (1, 0, 2)).astype(jnp.bfloat16)       # (H, S, Dh)

        s = jnp.einsum('hqd,hkd->hqk', qh, kh,
                       preferred_element_type=jnp.float32)       # (H, S, S)
        s = s + mbias[b:b + 1].reshape(1, 1, seq)                # key-padding mask

        m = jnp.max(s, axis=-1, keepdims=True)
        p = jnp.exp(s - m)
        denom = jnp.sum(p, axis=-1, keepdims=True)
        p = p * pl.reciprocal(denom, approx=True)                # EUP, not VALU

        ctx = jnp.einsum('hqk,hkd->hqd', p.astype(jnp.bfloat16), vh,
                         preferred_element_type=jnp.float32)     # (H, S, Dh)
        ctx_rows.append(jnp.transpose(ctx, (1, 0, 2)).reshape(seq, D))
    ctx = jnp.concatenate(ctx_rows, axis=0)                      # (B*S, D)

    attn = jnp.dot(ctx.astype(jnp.bfloat16), wo_ref[...],
                   preferred_element_type=jnp.float32) + bo_ref[...]

    # --- add & LayerNorm 1 (post-norm, f32) -----------------------------------
    # TODO(synk): nn.Dropout(p=0.1) inside the layer is treated as eval-mode identity.
    h1 = x + attn
    mu1 = jnp.mean(h1, axis=-1, keepdims=True)
    var1 = jnp.mean(jnp.square(h1 - mu1), axis=-1, keepdims=True)
    h1n = (h1 - mu1) * jax.lax.rsqrt(var1 + 1e-5) * ln1w_ref[...] + ln1b_ref[...]

    # --- feed-forward (ReLU, dim_feedforward) ---------------------------------
    f = jnp.dot(h1n.astype(jnp.bfloat16), w1_ref[...],
                preferred_element_type=jnp.float32) + b1_ref[...]
    f = jnp.maximum(f, 0.0)
    f = jnp.dot(f.astype(jnp.bfloat16), w2_ref[...],
                preferred_element_type=jnp.float32) + b2_ref[...]

    # --- add & LayerNorm 2 -----------------------------------------------------
    h2 = h1n + f
    mu2 = jnp.mean(h2, axis=-1, keepdims=True)
    var2 = jnp.mean(jnp.square(h2 - mu2), axis=-1, keepdims=True)
    o_ref[...] = ((h2 - mu2) * jax.lax.rsqrt(var2 + 1e-5) * ln2w_ref[...]
                  + ln2b_ref[...]).astype(o_ref.dtype)


def _encoder_stack(x_flat, mask_bias, p, *, n_head, batch, seq):
    """x_flat: (B*S, D) f32, mask_bias: (B, S) f32 (-1e30 at padded keys)."""
    BS, D = x_flat.shape
    L = p["wq_t"].shape[0]
    FF = p["w1_t"].shape[2]
    bf16 = jnp.bfloat16

    def lspec(*shape):                      # per-layer (stacked) parameter
        return pl.BlockSpec((None,) + tuple(shape),
                            lambda l, _n=len(shape): (l,) + (0,) * _n)

    x_spec = pl.BlockSpec((BS, D), lambda l: (0, 0))     # grid-invariant
    m_spec = pl.BlockSpec((batch, seq), lambda l: (0, 0))
    out_spec = pl.BlockSpec((BS, D), lambda l: (0, 0))   # resident across layers

    in_specs = [
        x_spec, m_spec,
        lspec(D, D), lspec(1, D),      # q proj
        lspec(D, D), lspec(1, D),      # k proj
        lspec(D, D), lspec(1, D),      # v proj
        lspec(D, D), lspec(1, D),      # out proj
        lspec(1, D), lspec(1, D),      # layernorm 1
        lspec(D, FF), lspec(1, FF),    # ffn linear 1
        lspec(FF, D), lspec(1, D),     # ffn linear 2
        lspec(1, D), lspec(1, D),      # layernorm 2
    ]

    kernel = functools.partial(_encoder_stack_kernel,
                               n_head=n_head, batch=batch, seq=seq)
    return pl.pallas_call(
        kernel,
        out_shape=jax.ShapeDtypeStruct((BS, D), jnp.float32),
        grid_spec=pltpu.PrefetchScalarGridSpec(
            num_scalar_prefetch=0,
            grid=(L,),
            in_specs=in_specs,
            out_specs=out_spec,
        ),
        compiler_params=pltpu.CompilerParams(
            dimension_semantics=("arbitrary",)),   # layers are sequential
    )(x_flat, mask_bias,
      p["wq_t"].astype(bf16), p["bq"],
      p["wk_t"].astype(bf16), p["bk"],
      p["wv_t"].astype(bf16), p["bv"],
      p["wo_t"].astype(bf16), p["bo"],
      p["ln1_w"], p["ln1_b"],
      p["w1_t"].astype(bf16), p["b1"],
      p["w2_t"].astype(bf16), p["b2"],
      p["ln2_w"], p["ln2_b"])


# ----------------------------------------------------------------------------
# Wrapper reproducing TransformerEncoder.forward (reduce=False)
# ----------------------------------------------------------------------------
def transformer_encoder_forward(x_sbd, mask_sb, params, *, n_head):
    """x_sbd: (S, B, D) float32; mask_sb: (S, B) bool (True = padded key)."""
    S, B, D = x_sbd.shape
    # trackarray = cat of arange(x.shape[1]) repeated x.shape[0] times -> (S, B)
    # TODO(synk): PyTorch uses LongTensor (int64); int32 is used here (TPU-native).
    trackarray = jnp.broadcast_to(jnp.arange(B, dtype=jnp.int32)[None, :], (S, B))

    mask_bias = mask_sb.T.astype(jnp.float32) * jnp.float32(-1e30)   # (B, S)
    x_flat = jnp.transpose(x_sbd, (1, 0, 2)).reshape(B * S, D)       # batch-major

    # TODO(synk): the reduce=True "extract" path (topk over summed attention +
    # token gathering) and per-layer attention-weight return are not implemented;
    # the module defaults to reduce=False and nn.TransformerEncoderLayer does not
    # return attention weights.
    out_flat = _encoder_stack(x_flat, mask_bias, params,
                              n_head=n_head, batch=B, seq=S)

    out = jnp.transpose(out_flat.reshape(B, S, D), (1, 0, 2))
    return out, trackarray


def init_params(key, num_layers, d_model, n_head, dim_feedforward=2048):
    """All per-layer params stacked along a leading layer axis."""
    assert d_model % n_head == 0
    L, D, FF = num_layers, d_model, dim_feedforward
    ks = jax.random.split(key, 10)
    std = 0.05

    def rnd(k, shape):
        return jax.random.normal(k, shape, jnp.float32) * std

    return dict(
        # weights pre-transposed to (in, out) so the kernel does x @ W
        wq_t=rnd(ks[0], (L, D, D)), bq=rnd(ks[1], (L, 1, D)),
        wk_t=rnd(ks[2], (L, D, D)), bk=rnd(ks[3], (L, 1, D)),
        wv_t=rnd(ks[4], (L, D, D)), bv=rnd(ks[5], (L, 1, D)),
        wo_t=rnd(ks[6], (L, D, D)), bo=rnd(ks[7], (L, 1, D)),
        ln1_w=jnp.ones((L, 1, D), jnp.float32),
        ln1_b=jnp.zeros((L, 1, D), jnp.float32),
        w1_t=rnd(ks[8], (L, D, FF)), b1=jnp.zeros((L, 1, FF), jnp.float32),
        w2_t=rnd(ks[9], (L, FF, D)), b2=jnp.zeros((L, 1, D), jnp.float32),
        ln2_w=jnp.ones((L, 1, D), jnp.float32),
        ln2_b=jnp.zeros((L, 1, D), jnp.float32),
    )


if __name__ == "__main__":
    num_layers, d_model, n_head = 2, 32, 4
    S, B = 8, 2

    key = jax.random.PRNGKey(0)
    kx, kp = jax.random.split(key)
    x = jax.random.normal(kx, (S, B, d_model), jnp.float32)
    # key-padding mask, PyTorch-style (S, B); pad the last 2 tokens of batch 1
    mask = jnp.zeros((S, B), dtype=bool).at[-2:, 1].set(True)

    params = init_params(kp, num_layers, d_model, n_head)

    out, track = transformer_encoder_forward(x, mask, params, n_head=n_head)
    out, track = jax.block_until_ready((out, track))

    assert out.shape == (S, B, d_model)
    assert track.shape == (S, B)
    assert bool(jnp.all(jnp.isfinite(out)))
    print("KERNEL_OK")
</pallas_src>

<mosaic_0001>
module attributes {stable_mosaic.version = 11 : i64} {
  func.func @_encoder_stack_kernel(%arg0: i32, %arg1: memref<16x32xf32, #tpu.memory_space<vmem>>, %arg2: memref<2x8xf32, #tpu.memory_space<vmem>>, %arg3: memref<1x32x32xbf16, #tpu.memory_space<vmem>>, %arg4: memref<1x1x32xf32, #tpu.memory_space<vmem>>, %arg5: memref<1x32x32xbf16, #tpu.memory_space<vmem>>, %arg6: memref<1x1x32xf32, #tpu.memory_space<vmem>>, %arg7: memref<1x32x32xbf16, #tpu.memory_space<vmem>>, %arg8: memref<1x1x32xf32, #tpu.memory_space<vmem>>, %arg9: memref<1x32x32xbf16, #tpu.memory_space<vmem>>, %arg10: memref<1x1x32xf32, #tpu.memory_space<vmem>>, %arg11: memref<1x1x32xf32, #tpu.memory_space<vmem>>, %arg12: memref<1x1x32xf32, #tpu.memory_space<vmem>>, %arg13: memref<1x32x2048xbf16, #tpu.memory_space<vmem>>, %arg14: memref<1x1x2048xf32, #tpu.memory_space<vmem>>, %arg15: memref<1x2048x32xbf16, #tpu.memory_space<vmem>>, %arg16: memref<1x1x32xf32, #tpu.memory_space<vmem>>, %arg17: memref<1x1x32xf32, #tpu.memory_space<vmem>>, %arg18: memref<1x1x32xf32, #tpu.memory_space<vmem>>, %arg19: memref<16x32xf32, #tpu.memory_space<vmem>>) attributes {dimension_semantics = [#tpu.dimension_semantics<arbitrary>], iteration_bounds = array<i64: 2>, scalar_prefetch = 0 : i64, scratch_operands = 0 : i64, tpu.core_type = #tpu.core_type<tc>, window_params = [{pipeline_mode = #tpu.pipeline_mode<synchronous>, transform_indices = @transform_0, window_bounds = array<i64: 16, 32>}, {pipeline_mode = #tpu.pipeline_mode<synchronous>, transform_indices = @transform_1, window_bounds = array<i64: 2, 8>}, {transform_indices = @transform_2, window_bounds = array<i64: 1, 32, 32>}, {transform_indices = @transform_3, window_bounds = array<i64: 1, 1, 32>}, {transform_indices = @transform_4, window_bounds = array<i64: 1, 32, 32>}, {transform_indices = @transform_5, window_bounds = array<i64: 1, 1, 32>}, {transform_indices = @transform_6, window_bounds = array<i64: 1, 32, 32>}, {transform_indices = @transform_7, window_bounds = array<i64: 1, 1, 32>}, {transform_indices = @transform_8, window_bounds = array<i64: 1, 32, 32>}, {transform_indices = @transform_9, window_bounds = array<i64: 1, 1, 32>}, {transform_indices = @transform_10, window_bounds = array<i64: 1, 1, 32>}, {transform_indices = @transform_11, window_bounds = array<i64: 1, 1, 32>}, {transform_indices = @transform_12, window_bounds = array<i64: 1, 32, 2048>}, {transform_indices = @transform_13, window_bounds = array<i64: 1, 1, 2048>}, {transform_indices = @transform_14, window_bounds = array<i64: 1, 2048, 32>}, {transform_indices = @transform_15, window_bounds = array<i64: 1, 1, 32>}, {transform_indices = @transform_16, window_bounds = array<i64: 1, 1, 32>}, {transform_indices = @transform_17, window_bounds = array<i64: 1, 1, 32>}, {pipeline_mode = #tpu.pipeline_mode<synchronous>, transform_indices = @transform_18, window_bounds = array<i64: 16, 32>}]} {
    %c0_i32 = arith.constant 0 : i32
    %0 = arith.cmpi eq, %arg0, %c0_i32 : i32
    %1 = arith.extui %0 : i1 to i32
    %c0_i32_0 = arith.constant 0 : i32
    %2 = arith.cmpi ne, %1, %c0_i32_0 : i32
    scf.if %2 {
      %c0_80 = arith.constant 0 : index
      %c0_81 = arith.constant 0 : index
      %175 = vector.load %arg1[%c0_80, %c0_81] : memref<16x32xf32, #tpu.memory_space<vmem>>, vector<16x32xf32>
      %c0_82 = arith.constant 0 : index
      %c0_83 = arith.constant 0 : index
      %176 = vector.load %arg19[%c0_82, %c0_83] : memref<16x32xf32, #tpu.memory_space<vmem>>, vector<16x32xf32>
      tpu.vector_store %arg19[%c0_82, %c0_83], %175 {strides = array<i32>} : memref<16x32xf32, #tpu.memory_space<vmem>>, vector<16x32xf32>,
    } else {
    }
    %c0 = arith.constant 0 : index
    %c0_1 = arith.constant 0 : index
    %3 = vector.load %arg19[%c0, %c0_1] : memref<16x32xf32, #tpu.memory_space<vmem>>, vector<16x32xf32>
    %4 = arith.truncf %3 : vector<16x32xf32> to vector<16x32xbf16>
    %c0_2 = arith.constant 0 : index
    %c0_3 = arith.constant 0 : index
    %c0_4 = arith.constant 0 : index
    %5 = vector.load %arg3[%c0_2, %c0_3, %c0_4] : memref<1x32x32xbf16, #tpu.memory_space<vmem>>, vector<1x32x32xbf16>
    %6 = vector.shape_cast %5 : vector<1x32x32xbf16> to vector<32x32xbf16>
    %cst = arith.constant dense<0.000000e+00> : vector<16x32xf32>
    %7 = tpu.matmul %4, %6, %cst {dimension_numbers = #tpu.dot_dimension_numbers<[1], [0], [0], [1], [0, 0, 1, 1], [], []>} : vector<16x32xbf16>, vector<32x32xbf16>, vector<16x32xf32> -> vector<16x32xf32>
    %c0_5 = arith.constant 0 : index
    %c0_6 = arith.constant 0 : index
    %c0_7 = arith.constant 0 : index
    %8 = vector.load %arg4[%c0_5, %c0_6, %c0_7] : memref<1x1x32xf32, #tpu.memory_space<vmem>>, vector<1x1x32xf32>
    %9 = vector.shape_cast %8 : vector<1x1x32xf32> to vector<1x32xf32>
    %10 = vector.broadcast %9 : vector<1x32xf32> to vector<16x32xf32>
    %11 = arith.addf %7, %10 : vector<16x32xf32>
    %c0_8 = arith.constant 0 : index
    %c0_9 = arith.constant 0 : index
    %c0_10 = arith.constant 0 : index
    %12 = vector.load %arg5[%c0_8, %c0_9, %c0_10] : memref<1x32x32xbf16, #tpu.memory_space<vmem>>, vector<1x32x32xbf16>
    %13 = vector.shape_cast %12 : vector<1x32x32xbf16> to vector<32x32xbf16>
    %cst_11 = arith.constant dense<0.000000e+00> : vector<16x32xf32>
    %14 = tpu.matmul %4, %13, %cst_11 {dimension_numbers = #tpu.dot_dimension_numbers<[1], [0], [0], [1], [0, 0, 1, 1], [], []>} : vector<16x32xbf16>, vector<32x32xbf16>, vector<16x32xf32> -> vector<16x32xf32>
    %c0_12 = arith.constant 0 : index
    %c0_13 = arith.constant 0 : index
    %c0_14 = arith.constant 0 : index
    %15 = vector.load %arg6[%c0_12, %c0_13, %c0_14] : memref<1x1x32xf32, #tpu.memory_space<vmem>>, vector<1x1x32xf32>
    %16 = vector.shape_cast %15 : vector<1x1x32xf32> to vector<1x32xf32>
    %17 = vector.broadcast %16 : vector<1x32xf32> to vector<16x32xf32>
    %18 = arith.addf %14, %17 : vector<16x32xf32>
    %c0_15 = arith.constant 0 : index
    %c0_16 = arith.constant 0 : index
    %c0_17 = arith.constant 0 : index
    %19 = vector.load %arg7[%c0_15, %c0_16, %c0_17] : memref<1x32x32xbf16, #tpu.memory_space<vmem>>, vector<1x32x32xbf16>
    %20 = vector.shape_cast %19 : vector<1x32x32xbf16> to vector<32x32xbf16>
    %cst_18 = arith.constant dense<0.000000e+00> : vector<16x32xf32>
    %21 = tpu.matmul %4, %20, %cst_18 {dimension_numbers = #tpu.dot_dimension_numbers<[1], [0], [0], [1], [0, 0, 1, 1], [], []>} : vector<16x32xbf16>, vector<32x32xbf16>, vector<16x32xf32> -> vector<16x32xf32>
    %c0_19 = arith.constant 0 : index
    %c0_20 = arith.constant 0 : index
    %c0_21 = arith.constant 0 : index
    %22 = vector.load %arg8[%c0_19, %c0_20, %c0_21] : memref<1x1x32xf32, #tpu.memory_space<vmem>>, vector<1x1x32xf32>
    %23 = vector.shape_cast %22 : vector<1x1x32xf32> to vector<1x32xf32>
    %24 = vector.broadcast %23 : vector<1x32xf32> to vector<16x32xf32>
    %25 = arith.addf %21, %24 : vector<16x32xf32>
    %c0_22 = arith.constant 0 : index
    %c0_23 = arith.constant 0 : index
    %26 = vector.load %arg2[%c0_22, %c0_23] : memref<2x8xf32, #tpu.memory_space<vmem>>, vector<2x8xf32>
    %27 = vector.extract_strided_slice %11 {offsets = [0, 0], sizes = [8, 32], strides = [1, 1]} : vector<16x32xf32> to vector<8x32xf32>
    %cst_24 = arith.constant 0.353553385 : f32
    %28 = vector.broadcast %cst_24 : f32 to vector<8x32xf32>
    %29 = arith.mulf %27, %28 : vector<8x32xf32>
    %30 = vector.shape_cast %29 : vector<8x32xf32> to vector<8x4x8xf32>
    %31 = tpu.transpose %30, [1, 0, 2] : vector<8x4x8xf32> -> vector<4x8x8xf32>
    %32 = arith.truncf %31 : vector<4x8x8xf32> to vector<4x8x8xbf16>
    %33 = vector.extract_strided_slice %18 {offsets = [0, 0], sizes = [8, 32], strides = [1, 1]} : vector<16x32xf32> to vector<8x32xf32>
    %34 = vector.shape_cast %33 : vector<8x32xf32> to vector<8x4x8xf32>
    %35 = tpu.transpose %34, [1, 0, 2] : vector<8x4x8xf32> -> vector<4x8x8xf32>
    %36 = arith.truncf %35 : vector<4x8x8xf32> to vector<4x8x8xbf16>
    %37 = vector.extract_strided_slice %25 {offsets = [0, 0], sizes = [8, 32], strides = [1, 1]} : vector<16x32xf32> to vector<8x32xf32>
    %38 = vector.shape_cast %37 : vector<8x32xf32> to vector<8x4x8xf32>
    %39 = tpu.transpose %38, [1, 0, 2] : vector<8x4x8xf32> -> vector<4x8x8xf32>
    %40 = arith.truncf %39 : vector<4x8x8xf32> to vector<4x8x8xbf16>
    "tpu.trace_start"() <{level = 10 : i32, message = "hqd,hkd->hqk"}> : () -> ()
    %cst_25 = arith.constant dense<0.000000e+00> : vector<4x8x8xf32>
    %41 = tpu.matmul %32, %36, %cst_25 {dimension_numbers = #tpu.dot_dimension_numbers<[2], [2], [1], [1], [0, 0, 0, 1, 1, 1], [0], [0]>} : vector<4x8x8xbf16>, vector<4x8x8xbf16>, vector<4x8x8xf32> -> vector<4x8x8xf32>
    "tpu.trace_stop"() : () -> ()
    %42 = vector.extract_strided_slice %26 {offsets = [0, 0], sizes = [1, 8], strides = [1, 1]} : vector<2x8xf32> to vector<1x8xf32>
    %43 = vector.shape_cast %42 : vector<1x8xf32> to vector<1x1x8xf32>
    %44 = vector.broadcast %43 : vector<1x1x8xf32> to vector<4x8x8xf32>
    %45 = arith.addf %41, %44 : vector<4x8x8xf32>
    %cst_26 = arith.constant dense<0xFF800000> : vector<4x8xf32>
    %46 = vector.multi_reduction <maximumf>, %45, %cst_26 [2] : vector<4x8x8xf32> to vector<4x8xf32>
    %47 = vector.shape_cast %46 : vector<4x8xf32> to vector<4x8x1xf32>
    %48 = vector.broadcast %47 : vector<4x8x1xf32> to vector<4x8x8xf32>
    %49 = arith.subf %45, %48 : vector<4x8x8xf32>
    %50 = math.exp %49 : vector<4x8x8xf32>
    %cst_27 = arith.constant dense<0.000000e+00> : vector<4x8xf32>
    %51 = vector.multi_reduction <add>, %50, %cst_27 [2] : vector<4x8x8xf32> to vector<4x8xf32>
    %52 = vector.shape_cast %51 : vector<4x8xf32> to vector<4x8x1xf32>
    %53 = tpu.reciprocal %52 {approx = true} : vector<4x8x1xf32> -> vector<4x8x1xf32>
    %54 = vector.broadcast %53 : vector<4x8x1xf32> to vector<4x8x8xf32>
    %55 = arith.mulf %50, %54 : vector<4x8x8xf32>
    %56 = arith.truncf %55 : vector<4x8x8xf32> to vector<4x8x8xbf16>
    "tpu.trace_start"() <{level = 10 : i32, message = "hqk,hkd->hqd"}> : () -> ()
    %cst_28 = arith.constant dense<0.000000e+00> : vector<4x8x8xf32>
    %57 = tpu.matmul %56, %40, %cst_28 {dimension_numbers = #tpu.dot_dimension_numbers<[2], [1], [1], [2], [0, 0, 0, 1, 1, 2], [0], [0]>} : vector<4x8x8xbf16>, vector<4x8x8xbf16>, vector<4x8x8xf32> -> vector<4x8x8xf32>
    "tpu.trace_stop"() : () -> ()
    %58 = tpu.transpose %57, [1, 0, 2] : vector<4x8x8xf32> -> vector<8x4x8xf32>
    %59 = vector.shape_cast %58 : vector<8x4x8xf32> to vector<8x32xf32>
    %60 = vector.extract_strided_slice %11 {offsets = [8, 0], sizes = [8, 32], strides = [1, 1]} : vector<16x32xf32> to vector<8x32xf32>
    %cst_29 = arith.constant 0.353553385 : f32
    %61 = vector.broadcast %cst_29 : f32 to vector<8x32xf32>
    %62 = arith.mulf %60, %61 : vector<8x32xf32>
    %63 = vector.shape_cast %62 : vector<8x32xf32> to vector<8x4x8xf32>
    %64 = tpu.transpose %63, [1, 0, 2] : vector<8x4x8xf32> -> vector<4x8x8xf32>
    %65 = arith.truncf %64 : vector<4x8x8xf32> to vector<4x8x8xbf16>
    %66 = vector.extract_strided_slice %18 {offsets = [8, 0], sizes = [8, 32], strides = [1, 1]} : vector<16x32xf32> to vector<8x32xf32>
    %67 = vector.shape_cast %66 : vector<8x32xf32> to vector<8x4x8xf32>
    %68 = tpu.transpose %67, [1, 0, 2] : vector<8x4x8xf32> -> vector<4x8x8xf32>
    %69 = arith.truncf %68 : vector<4x8x8xf32> to vector<4x8x8xbf16>
    %70 = vector.extract_strided_slice %25 {offsets = [8, 0], sizes = [8, 32], strides = [1, 1]} : vector<16x32xf32> to vector<8x32xf32>
    %71 = vector.shape_cast %70 : vector<8x32xf32> to vector<8x4x8xf32>
    %72 = tpu.transpose %71, [1, 0, 2] : vector<8x4x8xf32> -> vector<4x8x8xf32>
    %73 = arith.truncf %72 : vector<4x8x8xf32> to vector<4x8x8xbf16>
    "tpu.trace_start"() <{level = 10 : i32, message = "hqd,hkd->hqk"}> : () -> ()
    %cst_30 = arith.constant dense<0.000000e+00> : vector<4x8x8xf32>
    %74 = tpu.matmul %65, %69, %cst_30 {dimension_numbers = #tpu.dot_dimension_numbers<[2], [2], [1], [1], [0, 0, 0, 1, 1, 1], [0], [0]>} : vector<4x8x8xbf16>, vector<4x8x8xbf16>, vector<4x8x8xf32> -> vector<4x8x8xf32>
    "tpu.trace_stop"() : () -> ()
    %75 = vector.extract_strided_slice %26 {offsets = [1, 0], sizes = [1, 8], strides = [1, 1]} : vector<2x8xf32> to vector<1x8xf32>
    %76 = vector.shape_cast %75 : vector<1x8xf32> to vector<1x1x8xf32>
    %77 = vector.broadcast %76 : vector<1x1x8xf32> to vector<4x8x8xf32>
    %78 = arith.addf %74, %77 : vector<4x8x8xf32>
    %cst_31 = arith.constant dense<0xFF800000> : vector<4x8xf32>
    %79 = vector.multi_reduction <maximumf>, %78, %cst_31 [2] : vector<4x8x8xf32> to vector<4x8xf32>
    %80 = vector.shape_cast %79 : vector<4x8xf32> to vector<4x8x1xf32>
    %81 = vector.broadcast %80 : vector<4x8x1xf32> to vector<4x8x8xf32>
    %82 = arith.subf %78, %81 : vector<4x8x8xf32>
    %83 = math.exp %82 : vector<4x8x8xf32>
    %cst_32 = arith.constant dense<0.000000e+00> : vector<4x8xf32>
    %84 = vector.multi_reduction <add>, %83, %cst_32 [2] : vector<4x8x8xf32> to vector<4x8xf32>
    %85 = vector.shape_cast %84 : vector<4x8xf32> to vector<4x8x1xf32>
    %86 = tpu.reciprocal %85 {approx = true} : vector<4x8x1xf32> -> vector<4x8x1xf32>
    %87 = vector.broadcast %86 : vector<4x8x1xf32> to vector<4x8x8xf32>
    %88 = arith.mulf %83, %87 : vector<4x8x8xf32>
    %89 = arith.truncf %88 : vector<4x8x8xf32> to vector<4x8x8xbf16>
    "tpu.trace_start"() <{level = 10 : i32, message = "hqk,hkd->hqd"}> : () -> ()
    %cst_33 = arith.constant dense<0.000000e+00> : vector<4x8x8xf32>
    %90 = tpu.matmul %89, %73, %cst_33 {dimension_numbers = #tpu.dot_dimension_numbers<[2], [1], [1], [2], [0, 0, 0, 1, 1, 2], [0], [0]>} : vector<4x8x8xbf16>, vector<4x8x8xbf16>, vector<4x8x8xf32> -> vector<4x8x8xf32>
    "tpu.trace_stop"() : () -> ()
    %91 = tpu.transpose %90, [1, 0, 2] : vector<4x8x8xf32> -> vector<8x4x8xf32>
    %92 = vector.shape_cast %91 : vector<8x4x8xf32> to vector<8x32xf32>
    %93 = tpu.concatenate %59, %92 in 0 : vector<8x32xf32>, vector<8x32xf32> -> vector<16x32xf32>
    %94 = arith.truncf %93 : vector<16x32xf32> to vector<16x32xbf16>
    %c0_34 = arith.constant 0 : index
    %c0_35 = arith.constant 0 : index
    %c0_36 = arith.constant 0 : index
    %95 = vector.load %arg9[%c0_34, %c0_35, %c0_36] : memref<1x32x32xbf16, #tpu.memory_space<vmem>>, vector<1x32x32xbf16>
    %96 = vector.shape_cast %95 : vector<1x32x32xbf16> to vector<32x32xbf16>
    %cst_37 = arith.constant dense<0.000000e+00> : vector<16x32xf32>
    %97 = tpu.matmul %94, %96, %cst_37 {dimension_numbers = #tpu.dot_dimension_numbers<[1], [0], [0], [1], [0, 0, 1, 1], [], []>} : vector<16x32xbf16>, vector<32x32xbf16>, vector<16x32xf32> -> vector<16x32xf32>
    %c0_38 = arith.constant 0 : index
    %c0_39 = arith.constant 0 : index
    %c0_40 = arith.constant 0 : index
    %98 = vector.load %arg10[%c0_38, %c0_39, %c0_40] : memref<1x1x32xf32, #tpu.memory_space<vmem>>, vector<1x1x32xf32>
    %99 = vector.shape_cast %98 : vector<1x1x32xf32> to vector<1x32xf32>
    %100 = vector.broadcast %99 : vector<1x32xf32> to vector<16x32xf32>
    %101 = arith.addf %97, %100 : vector<16x32xf32>
    %102 = arith.addf %3, %101 : vector<16x32xf32>
    %cst_41 = arith.constant dense<0.000000e+00> : vector<16xf32>
    %103 = vector.multi_reduction <add>, %102, %cst_41 [1] : vector<16x32xf32> to vector<16xf32>
    %104 = vector.shape_cast %103 : vector<16xf32> to vector<16x1xf32>
    %cst_42 = arith.constant 3.200000e+01 : f32
    %105 = vector.broadcast %cst_42 : f32 to vector<16x1xf32>
    %106 = arith.divf %104, %105 : vector<16x1xf32>
    %107 = vector.broadcast %106 : vector<16x1xf32> to vector<16x32xf32>
    %108 = arith.subf %102, %107 : vector<16x32xf32>
    %109 = arith.mulf %108, %108 : vector<16x32xf32>
    %cst_43 = arith.constant dense<0.000000e+00> : vector<16xf32>
    %110 = vector.multi_reduction <add>, %109, %cst_43 [1] : vector<16x32xf32> to vector<16xf32>
    %111 = vector.shape_cast %110 : vector<16xf32> to vector<16x1xf32>
    %cst_44 = arith.constant 3.200000e+01 : f32
    %112 = vector.broadcast %cst_44 : f32 to vector<16x1xf32>
    %113 = arith.divf %111, %112 : vector<16x1xf32>
    %114 = vector.broadcast %106 : vector<16x1xf32> to vector<16x32xf32>
    %115 = arith.subf %102, %114 : vector<16x32xf32>
    %cst_45 = arith.constant 9.99999974E-6 : f32
    %116 = vector.broadcast %cst_45 : f32 to vector<16x1xf32>
    %117 = arith.addf %113, %116 : vector<16x1xf32>
    %118 = math.rsqrt %117 : vector<16x1xf32>
    %119 = vector.broadcast %118 : vector<16x1xf32> to vector<16x32xf32>
    %120 = arith.mulf %115, %119 : vector<16x32xf32>
    %c0_46 = arith.constant 0 : index
    %c0_47 = arith.constant 0 : index
    %c0_48 = arith.constant 0 : index
    %121 = vector.load %arg11[%c0_46, %c0_47, %c0_48] : memref<1x1x32xf32, #tpu.memory_space<vmem>>, vector<1x1x32xf32>
    %122 = vector.shape_cast %121 : vector<1x1x32xf32> to vector<1x32xf32>
    %123 = vector.broadcast %122 : vector<1x32xf32> to vector<16x32xf32>
    %124 = arith.mulf %120, %123 : vector<16x32xf32>
    %c0_49 = arith.constant 0 : index
    %c0_50 = arith.constant 0 : index
    %c0_51 = arith.constant 0 : index
    %125 = vector.load %arg12[%c0_49, %c0_50, %c0_51] : memref<1x1x32xf32, #tpu.memory_space<vmem>>, vector<1x1x32xf32>
    %126 = vector.shape_cast %125 : vector<1x1x32xf32> to vector<1x32xf32>
    %127 = vector.broadcast %126 : vector<1x32xf32> to vector<16x32xf32>
    %128 = arith.addf %124, %127 : vector<16x32xf32>
    %129 = arith.truncf %128 : vector<16x32xf32> to vector<16x32xbf16>
    %c0_52 = arith.constant 0 : index
    %c0_53 = arith.constant 0 : index
    %c0_54 = arith.constant 0 : index
    %130 = vector.load %arg13[%c0_52, %c0_53, %c0_54] : memref<1x32x2048xbf16, #tpu.memory_space<vmem>>, vector<1x32x2048xbf16>
    %131 = vector.shape_cast %130 : vector<1x32x2048xbf16> to vector<32x2048xbf16>
    %cst_55 = arith.constant dense<0.000000e+00> : vector<16x2048xf32>
    %132 = tpu.matmul %129, %131, %cst_55 {dimension_numbers = #tpu.dot_dimension_numbers<[1], [0], [0], [1], [0, 0, 1, 1], [], []>} : vector<16x32xbf16>, vector<32x2048xbf16>, vector<16x2048xf32> -> vector<16x2048xf32>
    %c0_56 = arith.constant 0 : index
    %c0_57 = arith.constant 0 : index
    %c0_58 = arith.constant 0 : index
    %133 = vector.load %arg14[%c0_56, %c0_57, %c0_58] : memref<1x1x2048xf32, #tpu.memory_space<vmem>>, vector<1x1x2048xf32>
    %134 = vector.shape_cast %133 : vector<1x1x2048xf32> to vector<1x2048xf32>
    %135 = vector.broadcast %134 : vector<1x2048xf32> to vector<16x2048xf32>
    %136 = arith.addf %132, %135 : vector<16x2048xf32>
    %cst_59 = arith.constant 0.000000e+00 : f32
    %137 = vector.broadcast %cst_59 : f32 to vector<16x2048xf32>
    %138 = arith.maximumf %136, %137 : vector<16x2048xf32>
    %139 = arith.truncf %138 : vector<16x2048xf32> to vector<16x2048xbf16>
    %c0_60 = arith.constant 0 : index
    %c0_61 = arith.constant 0 : index
    %c0_62 = arith.constant 0 : index
    %140 = vector.load %arg15[%c0_60, %c0_61, %c0_62] : memref<1x2048x32xbf16, #tpu.memory_space<vmem>>, vector<1x2048x32xbf16>
    %141 = vector.shape_cast %140 : vector<1x2048x32xbf16> to vector<2048x32xbf16>
    %cst_63 = arith.constant dense<0.000000e+00> : vector<16x32xf32>
    %142 = tpu.matmul %139, %141, %cst_63 {dimension_numbers = #tpu.dot_dimension_numbers<[1], [0], [0], [1], [0, 0, 1, 1], [], []>} : vector<16x2048xbf16>, vector<2048x32xbf16>, vector<16x32xf32> -> vector<16x32xf32>
    %c0_64 = arith.constant 0 : index
    %c0_65 = arith.constant 0 : index
    %c0_66 = arith.constant 0 : index
    %143 = vector.load %arg16[%c0_64, %c0_65, %c0_66] : memref<1x1x32xf32, #tpu.memory_space<vmem>>, vector<1x1x32xf32>
    %144 = vector.shape_cast %143 : vector<1x1x32xf32> to vector<1x32xf32>
    %145 = vector.broadcast %144 : vector<1x32xf32> to vector<16x32xf32>
    %146 = arith.addf %142, %145 : vector<16x32xf32>
    %147 = arith.addf %128, %146 : vector<16x32xf32>
    %cst_67 = arith.constant dense<0.000000e+00> : vector<16xf32>
    %148 = vector.multi_reduction <add>, %147, %cst_67 [1] : vector<16x32xf32> to vector<16xf32>
    %149 = vector.shape_cast %148 : vector<16xf32> to vector<16x1xf32>
    %cst_68 = arith.constant 3.200000e+01 : f32
    %150 = vector.broadcast %cst_68 : f32 to vector<16x1xf32>
    %151 = arith.divf %149, %150 : vector<16x1xf32>
    %152 = vector.broadcast %151 : vector<16x1xf32> to vector<16x32xf32>
    %153 = arith.subf %147, %152 : vector<16x32xf32>
    %154 = arith.mulf %153, %153 : vector<16x32xf32>
    %cst_69 = arith.constant dense<0.000000e+00> : vector<16xf32>
    %155 = vector.multi_reduction <add>, %154, %cst_69 [1] : vector<16x32xf32> to vector<16xf32>
    %156 = vector.shape_cast %155 : vector<16xf32> to vector<16x1xf32>
    %cst_70 = arith.constant 3.200000e+01 : f32
    %157 = vector.broadcast %cst_70 : f32 to vector<16x1xf32>
    %158 = arith.divf %156, %157 : vector<16x1xf32>
    %159 = vector.broadcast %151 : vector<16x1xf32> to vector<16x32xf32>
    %160 = arith.subf %147, %159 : vector<16x32xf32>
    %cst_71 = arith.constant 9.99999974E-6 : f32
    %161 = vector.broadcast %cst_71 : f32 to vector<16x1xf32>
    %162 = arith.addf %158, %161 : vector<16x1xf32>
    %163 = math.rsqrt %162 : vector<16x1xf32>
    %164 = vector.broadcast %163 : vector<16x1xf32> to vector<16x32xf32>
    %165 = arith.mulf %160, %164 : vector<16x32xf32>
    %c0_72 = arith.constant 0 : index
    %c0_73 = arith.constant 0 : index
    %c0_74 = arith.constant 0 : index
    %166 = vector.load %arg17[%c0_72, %c0_73, %c0_74] : memref<1x1x32xf32, #tpu.memory_space<vmem>>, vector<1x1x32xf32>
    %167 = vector.shape_cast %166 : vector<1x1x32xf32> to vector<1x32xf32>
    %168 = vector.broadcast %167 : vector<1x32xf32> to vector<16x32xf32>
    %169 = arith.mulf %165, %168 : vector<16x32xf32>
    %c0_75 = arith.constant 0 : index
    %c0_76 = arith.constant 0 : index
    %c0_77 = arith.constant 0 : index
    %170 = vector.load %arg18[%c0_75, %c0_76, %c0_77] : memref<1x1x32xf32, #tpu.memory_space<vmem>>, vector<1x1x32xf32>
    %171 = vector.shape_cast %170 : vector<1x1x32xf32> to vector<1x32xf32>
    %172 = vector.broadcast %171 : vector<1x32xf32> to vector<16x32xf32>
    %173 = arith.addf %169, %172 : vector<16x32xf32>
    %c0_78 = arith.constant 0 : index
    %c0_79 = arith.constant 0 : index
    %174 = vector.load %arg19[%c0_78, %c0_79] : memref<16x32xf32, #tpu.memory_space<vmem>>, vector<16x32xf32>
    tpu.vector_store %arg19[%c0_78, %c0_79], %173 {strides = array<i32>} : memref<16x32xf32, #tpu.memory_space<vmem>>, vector<16x32xf32>,
    return
  }
  func.func @transform_0(%arg0: i32) -> (i32, i32) {
    %c0_i32 = arith.constant 0 : i32
    %c0_i32_0 = arith.constant 0 : i32
    %c0_i32_1 = arith.constant 0 : i32
    return %c0_i32, %c0_i32_0 : i32, i32
  }
  func.func @transform_1(%arg0: i32) -> (i32, i32) {
    %c0_i32 = arith.constant 0 : i32
    %c0_i32_0 = arith.constant 0 : i32
    %c0_i32_1 = arith.constant 0 : i32
    return %c0_i32, %c0_i32_0 : i32, i32
  }
  func.func @transform_2(%arg0: i32) -> (i32, i32, i32) {
    %c0_i32 = arith.constant 0 : i32
    %c0_i32_0 = arith.constant 0 : i32
    %c0_i32_1 = arith.constant 0 : i32
    return %arg0, %c0_i32, %c0_i32_0 : i32, i32, i32
  }
  func.func @transform_3(%arg0: i32) -> (i32, i32, i32) {
    %c0_i32 = arith.constant 0 : i32
    %c0_i32_0 = arith.constant 0 : i32
    %c0_i32_1 = arith.constant 0 : i32
    return %arg0, %c0_i32, %c0_i32_0 : i32, i32, i32
  }
  func.func @transform_4(%arg0: i32) -> (i32, i32, i32) {
    %c0_i32 = arith.constant 0 : i32
    %c0_i32_0 = arith.constant 0 : i32
    %c0_i32_1 = arith.constant 0 : i32
    return %arg0, %c0_i32, %c0_i32_0 : i32, i32, i32
  }
  func.func @transform_5(%arg0: i32) -> (i32, i32, i32) {
    %c0_i32 = arith.constant 0 : i32
    %c0_i32_0 = arith.constant 0 : i32
    %c0_i32_1 = arith.constant 0 : i32
    return %arg0, %c0_i32, %c0_i32_0 : i32, i32, i32
  }
  func.func @transform_6(%arg0: i32) -> (i32, i32, i32) {
    %c0_i32 = arith.constant 0 : i32
    %c0_i32_0 = arith.constant 0 : i32
    %c0_i32_1 = arith.constant 0 : i32
    return %arg0, %c0_i32, %c0_i32_0 : i32, i32, i32
  }
  func.func @transform_7(%arg0: i32) -> (i32, i32, i32) {
    %c0_i32 = arith.constant 0 : i32
    %c0_i32_0 = arith.constant 0 : i32
    %c0_i32_1 = arith.constant 0 : i32
    return %arg0, %c0_i32, %c0_i32_0 : i32, i32, i32
  }
  func.func @transform_8(%arg0: i32) -> (i32, i32, i32) {
    %c0_i32 = arith.constant 0 : i32
    %c0_i32_0 = arith.constant 0 : i32
    %c0_i32_1 = arith.constant 0 : i32
    return %arg0, %c0_i32, %c0_i32_0 : i32, i32, i32
  }
  func.func @transform_9(%arg0: i32) -> (i32, i32, i32) {
    %c0_i32 = arith.constant 0 : i32
    %c0_i32_0 = arith.constant 0 : i32
    %c0_i32_1 = arith.constant 0 : i32
    return %arg0, %c0_i32, %c0_i32_0 : i32, i32, i32
  }
  func.func @transform_10(%arg0: i32) -> (i32, i32, i32) {
    %c0_i32 = arith.constant 0 : i32
    %c0_i32_0 = arith.constant 0 : i32
    %c0_i32_1 = arith.constant 0 : i32
    return %arg0, %c0_i32, %c0_i32_0 : i32, i32, i32
  }
  func.func @transform_11(%arg0: i32) -> (i32, i32, i32) {
    %c0_i32 = arith.constant 0 : i32
    %c0_i32_0 = arith.constant 0 : i32
    %c0_i32_1 = arith.constant 0 : i32
    return %arg0, %c0_i32, %c0_i32_0 : i32, i32, i32
  }
  func.func @transform_12(%arg0: i32) -> (i32, i32, i32) {
    %c0_i32 = arith.constant 0 : i32
    %c0_i32_0 = arith.constant 0 : i32
    %c0_i32_1 = arith.constant 0 : i32
    return %arg0, %c0_i32, %c0_i32_0 : i32, i32, i32
  }
  func.func @transform_13(%arg0: i32) -> (i32, i32, i32) {
    %c0_i32 = arith.constant 0 : i32
    %c0_i32_0 = arith.constant 0 : i32
    %c0_i32_1 = arith.constant 0 : i32
    return %arg0, %c0_i32, %c0_i32_0 : i32, i32, i32
  }
  func.func @transform_14(%arg0: i32) -> (i32, i32, i32) {
    %c0_i32 = arith.constant 0 : i32
    %c0_i32_0 = arith.constant 0 : i32
    %c0_i32_1 = arith.constant 0 : i32
    return %arg0, %c0_i32, %c0_i32_0 : i32, i32, i32
  }
  func.func @transform_15(%arg0: i32) -> (i32, i32, i32) {
    %c0_i32 = arith.constant 0 : i32
    %c0_i32_0 = arith.constant 0 : i32
    %c0_i32_1 = arith.constant 0 : i32
    return %arg0, %c0_i32, %c0_i32_0 : i32, i32, i32
  }
  func.func @transform_16(%arg0: i32) -> (i32, i32, i32) {
    %c0_i32 = arith.constant 0 : i32
    %c0_i32_0 = arith.constant 0 : i32
    %c0_i32_1 = arith.constant 0 : i32
    return %arg0, %c0_i32, %c0_i32_0 : i32, i32, i32
  }
  func.func @transform_17(%arg0: i32) -> (i32, i32, i32) {
    %c0_i32 = arith.constant 0 : i32
    %c0_i32_0 = arith.constant 0 : i32
    %c0_i32_1 = arith.constant 0 : i32
    return %arg0, %c0_i32, %c0_i32_0 : i32, i32, i32
  }
  func.func @transform_18(%arg0: i32) -> (i32, i32) {
    %c0_i32 = arith.constant 0 : i32
    %c0_i32_0 = arith.constant 0 : i32
    %c0_i32_1 = arith.constant 0 : i32
    return %c0_i32, %c0_i32_0 : i32, i32
  }
}

</mosaic_0001>

<bundles_post_ra>
// kernel: tpu_custom_call.1
= control target key start
LH: loop header
LB: loop body
LE: loop exit
PB: predicated region body
PF: predicated region fallthrough
CT: control target
= control target key end

     0   :  { %s7255_s0 = inlined_call_operand.vmem [shape: f32[16,32], index: 0, kind: input, shape index: {}]   ;;  %s7256_s1 = inlined_call_operand.vmem [shape: f32[2,8], index: 1, kind: input, shape index: {}]   ;;  %s7257_s2 = inlined_call_operand.vmem [shape: bf16[2,32,32], index: 2, kind: input, shape index: {}]   ;;  %s7258_s3 = inlined_call_operand.vmem [shape: f32[2,1,32], index: 3, kind: input, shape index: {}]   ;;  %s7259_s4 = inlined_call_operand.vmem [shape: bf16[2,32,32], index: 4, kind: input, shape index: {}]   ;;  %s7260_s5 = inlined_call_operand.vmem [shape: f32[2,1,32], index: 5, kind: input, shape index: {}]   ;;  %s7261_s6 = inlined_call_operand.vmem [shape: bf16[2,32,32], index: 6, kind: input, shape index: {}]   ;;  %s7262_s7 = inlined_call_operand.vmem [shape: f32[2,1,32], index: 7, kind: input, shape index: {}]   ;;  %s7263_s8 = inlined_call_operand.vmem [shape: bf16[2,32,32], index: 8, kind: input, shape index: {}]   ;;  %s7264_s9 = inlined_call_operand.vmem [shape: f32[2,1,32], index: 9, kind: input, shape index: {}]   ;;  %s7265_s10 = inlined_call_operand.vmem [shape: f32[2,1,32], index: 10, kind: input, shape index: {}]   ;;  %s7266_s11 = inlined_call_operand.vmem [shape: f32[2,1,32], index: 11, kind: input, shape index: {}]   ;;  %s7267_s12 = inlined_call_operand.vmem [shape: bf16[2,32,2048], index: 12, kind: input, shape index: {}]   ;;  %s7268_s13 = inlined_call_operand.vmem [shape: f32[2,1,2048], index: 13, kind: input, shape index: {}]   ;;  %s7269_s14 = inlined_call_operand.vmem [shape: bf16[2,2048,32], index: 14, kind: input, shape index: {}]   ;;  %s7270_s15 = inlined_call_operand.vmem [shape: f32[2,1,32], index: 15, kind: input, shape index: {}]   ;;  %s7271_s16 = inlined_call_operand.vmem [shape: f32[2,1,32], index: 16, kind: input, shape index: {}]   ;;  %s7272_s17 = inlined_call_operand.vmem [shape: f32[2,1,32], index: 17, kind: input, shape index: {}]   ;;  %s7273_s18 = inlined_call_operand.hbm [shape: f32[16,32], index: 18, kind: output, shape index: {}]  }
   0x1   :  { %7278 = sst [smem:[#allocation7_spill]] %s7255_s0 }
   0x2   :  { %7279 = sst [smem:[#allocation8_spill]] %s7256_s1 }
   0x3   :  { %7280 = sst [smem:[#allocation9_spill]] %s7257_s2 }
   0x4   :  { %7281 = sst [smem:[#allocation10_spill]] %s7258_s3 }
   0x5   :  { %7282 = sst [smem:[#allocation11_spill]] %s7259_s4 }
   0x6   :  { %7283 = sst [smem:[#allocation12_spill]] %s7260_s5 }
   0x7   :  { %7284 = sst [smem:[#allocation13_spill]] %s7261_s6 }
   0x8   :  { %7285 = sst [smem:[#allocation14_spill]] %s7263_s8 }
   0x9   :  { %7286 = sst [smem:[#allocation15_spill]] %s7267_s12 }
   0xa   :  { %7287 = sst [smem:[#allocation16_spill]] %s7268_s13 }
   0xb   :  { %7288 = sst [smem:[#allocation17_spill]] %s7272_s17 }
   0xc   :  { %7289 = sst [smem:[#allocation18_spill]] %s7273_s18 }
   0xd   :  { %23 = vsyncpa [#allocation3], 0  ;;  %s6419_s27 = smov 0  }
   0xe LB: > { %7290 = sst [smem:[#allocation5_spill]] %s6309_s27  ;;  %s6425_s28 = sadd.s32 4294967295, %s6309_s27   ;;  %s6309_s27 = sphi %s6419_s27, %s29_s27  }
   0xf   : > { %7291 = sst [smem:[#allocation6_spill]] %s6425_s28  ;;  %p5461_p0 = scmp.ge.s32.totalorder %s6309_s27, 1 }
  0x10   : > { %p639_p1 = scmp.lt.s32.totalorder %s6309_s27, 3 }
  0x12   : > { %p640_p2 = pnand %p5461_p0, %p639_p1 }
  0x13   : > { %p744_p3 = scmp.lt.s32.totalorder (!%p640_p2), %s6425_s28, 1  ;;  %s7293_s22 = sld [smem:[#allocation9_spill]] (!%p640_p2) }
  0x14   : > { %643 = sbr.rel (%p640_p2) target bundleno = 3169 (0xc61), region = 92  ;;  %s7294_s4 = sld [smem:[#allocation11_spill]] (!%p640_p2) }
  0x15   : > { %s7296_s6 = sld [smem:[#allocation13_spill]] (!%p640_p2) }
  0x16   : > { %s7297_s8 = sld [smem:[#allocation14_spill]] (!%p640_p2) }
  0x17   : > { %s7298_s12 = sld [smem:[#allocation15_spill]] (!%p640_p2) }
  0x18   : > { %s7299_s13 = sld [smem:[#allocation16_spill]] (!%p640_p2) }
  0x19   : > { %s6431_s29 = scalar_select %p744_p3, %s6425_s28, 1 }
  0x1b   : > { %s5701_s30 = sshll.u32 %s6431_s29, 4  ;;  %s5705_s5 = sshll.u32 %s6431_s29, 8 }
  0x1c   : > { %s6441_s2 = scalar_lea.vmem %s7293_s22, %s5701_s30  ;;  %s756_s25 = scalar_lea.vmem %s7294_s4, %s5701_s30 }
  0x1d   : > { %s6453_s0 = scalar_lea.vmem %s7296_s6, %s5701_s30  ;;  %s6462_s3 = scalar_lea.vmem %s7297_s8, %s5701_s30 }
  0x1e   : > { %s6480_s20 = scalar_lea.vmem %s7298_s12, %s5705_s5  ;;  %s6485_s8 = scalar_lea.vmem %s7299_s13, %s5701_s30 }
  0x1f   : > { %s5706_s23 = sshll.u32 %s6431_s29, 10  ;;  %s798_s27 = scalar_lea.vmem %s7270_s15, %s6431_s29 }
  0x20   : > { %s6495_s17 = scalar_lea.vmem %s7269_s14, %s5706_s23  ;;  %s801_s5 = scalar_lea.vmem %s7271_s16, %s6431_s29 }
  0x21   : > { %s7300_s12 = sld [smem:[#allocation17_spill]] }
  0x22   : > { %s7301_s30 = sld [smem:[#allocation6_spill]] }
  0x27   : > { %s804_s21 = scalar_lea.vmem %s7300_s12, %s6431_s29 }
  0x28   : > { %p5475_p4 = scmp.ne.s32.totalorder %s7301_s30, 0 }
  0x29   : > { %s7302_s4 = sld [smem:[#allocation7_spill]] (!%p5475_p4) }
  0x2a   : > { %809 = sbr.rel (%p5475_p4) target bundleno = 49 (0x31), region = 96 }
  0x2f   : > { %v810_v0 = vld [vmem:[%s7302_s4] sm:$0xff]  ;;  %vm812_vm0 = vcmask 261120   ;;  %v811_v1 = vld [vmem:[%s7302_s4 + $0x8] sm:$0xff] }
  0x30   : > { %813 = vst.msk [vmem:[#allocation2] sm:$0xff] %vm812_vm0, %v810_v0  ;;  %814 = vst.msk [vmem:[#allocation2 + $0x8] sm:$0xff] %vm812_vm0, %v811_v1 }
  0x31 PF: > { %v6097_v2 = vld [vmem:[%s756_s25 + $0x8] sm:$0xff]   ;;  %v6311_v3 = vmov 0.0   ;;  %v6099_v5 = vld [vmem:[%s756_s25] sm:$0xff]   ;;  %vm6312_vm1 = vmmov 0   ;;  %vm841_vm2 = vcmask 261120   ;;  %s7303_s13 = sld [smem:[#allocation12_spill]]  ;;  %v1031_v29 = vlaneseq  ;;  %s7307_s24 = scalar_lea.vmem %s7262_s7, %s6431_s29 }
  0x32   : > { %5935 = vmatprep.subr.bf16.mxu1 %v6311_v3  ;;  %5927 = vmatprep.subr.bf16.mxu0 %v6311_v3  ;;  %v6098_v4 = vld [vmem:[%s6441_s2 + $0x8] sm:$0xff]   ;;  %v6100_v6 = vld [vmem:[%s6441_s2] sm:$0xff]   ;;  %s7305_s26 = sld [smem:[#allocation10_spill]]  ;;  %s6313_s1 = smov 104   ;;  %v6316_v27 = vmov 1983009808  }
  0x33   : > { %5936 = vmatpush3.bf16.msra.mxu1 %v6097_v2  ;;  %5939 = vmatprep.mubr.msk.bf16.mxu1 %vm6312_vm1, %v6311_v3  ;;  %s6314_s19 = smov 120   ;;  %v6101_v20 = vld [vmem:[%s6453_s0 + $0x8] sm:$0xff]   ;;  %s6315_s30 = smov 112   ;;  %v6102_v26 = vld [vmem:[%s6453_s0] sm:$0xff]   ;;  %v1029_v28 = vunpack.c.l.s4 %v6316_v27  ;;  %v6317_v30 = vmov 1934713408  }
  0x34   : > { %5928 = vmatpush3.bf16.msra.mxu0 %v6098_v4  ;;  %5937 = vmatprep.subr.bf16.mxu1 %v6311_v3  ;;  %v1061_v31 = vunpack.c.l.s4 %v6317_v30  ;;  %v6557_v33 = vshrl.u32 %v1031_v29, 7  ;;  %vm1470_vm3 = vcmask 64512   ;;  %s7308_s12 = sld [smem:[#allocation8_spill]]  ;;  %vm1706_vm4 = vcmask 1043456   ;;  %s7311_s22 = scalar_lea.vmem %s7266_s11, %s6431_s29 }
  0x35   : > { %5929 = vmatprep.subr.bf16.mxu0 %v6311_v3  ;;  %5931 = vmatprep.mubr.msk.bf16.mxu0 %vm6312_vm1, %v6311_v3  ;;  %v1030_v32 = vunpack.c.0.s8 %v1029_v28  ;;  %vm2037_vm5 = vcmask 130048   ;;  %vm2039_vm6 = vcmask 195584  }
  0x36   : > { %v1062_v36 = vunpack.c.0.s8 %v1061_v31 }
  0x37   : > { %v815_v7 = vld [vmem:[#allocation2] sm:$0xff]  ;;  %v816_v8 = vld [vmem:[#allocation2 + $0x8] sm:$0xff]  ;;  %5938 = vmatpush3.bf16.msra.mxu1 %v6099_v5  ;;  %s7304_s2 = scalar_lea.vmem %s7303_s13, %s6431_s29  ;;  %v6560_v37 = vsub.s32 %v1030_v32, %v6557_v33  ;;  %s6319_s13 = smov 8  }
  0x38   : > { %v817_v9 = vpack.c.bf16 %v816_v8, %v815_v7  ;;  %5930 = vmatpush3.bf16.msra.mxu0 %v6100_v6  ;;  %5951 = vmatprep.subr.bf16.mxu1 %v6311_v3  ;;  %v5480_v10 = vld [vmem:[%s7304_s2] ss:$0 sm:$0xff]  ;;  %s7306_s28 = scalar_lea.vmem %s7305_s26, %s6431_s29  ;;  %v6563_v44 = vsub.s32 %v1062_v36, %v6557_v33  ;;  %s6320_s2 = smov 24  }
  0x39   : > { %5943 = vmatprep.subr.bf16.mxu0 %v6311_v3  ;;  %v5476_v11 = vld [vmem:[%s7306_s28] ss:$0 sm:$0xff]  ;;  %s7309_s26 = scalar_lea.vmem %s7264_s9, %s6431_s29 }
  0x3a   : > { %5940 = vmatmul.mubr.msk.bf16.vlgmr.msra.gmra.mxu1 %vm841_vm2, %v817_v9 }
  0x3b   : > { %5932 = vmatmul.mubr.msk.bf16.vlgmr.msra.gmra.mxu0 %vm841_vm2, %v817_v9  ;;  %5953 = vmatprep.mubr.msk.bf16.mxu1 %vm6312_vm1, %v6311_v3 }
  0x3c   : > { %5947 = vmatprep.mubr.msk.bf16.mxu0 %vm6312_vm1, %v6311_v3  ;;  %5944 = vmatpush3.bf16.msra.mxu0 %v6101_v20 }
  0x3d   : > { %5945 = vmatprep.subr.bf16.mxu0 %v6311_v3 }
  0x40   : > { %5946 = vmatpush3.bf16.msra.mxu0 %v6102_v26 }
  0x41   : > { %5957 = vmatprep.subr.bf16.mxu0 %v6311_v3 }
  0x43   : > { %5948 = vmatmul.mubr.msk.bf16.vlgmr.msra.gmra.mxu0 %vm841_vm2, %v817_v9 }
  0x44   : > { %5959 = vmatprep.mubr.msk.bf16.mxu0 %vm6312_vm1, %v6311_v3 }
  0xfa   : > { %v943_v12 = vpop.f32.mrf.mxu1 }
  0xfb   : > { %v944_v13 = vadd.f32 %v5480_v10, %v943_v12  ;;  %v879_v14 = vpop.f32.mrf.mxu0 }
  0xfc   : > { %v880_v15 = vadd.f32 %v5476_v11, %v879_v14  ;;  %v5941_v16 = vpop.f32.mrf.mxu1 }
  0xfd   : > { %1173 = vrot.lane.b32.xlu1 %v944_v13, %s6313_s1  ;;  %1167 = vrot.lane.b32.xlu0 %v944_v13, %s6314_s19  ;;  %v5933_v17 = vpop.f32.mrf.mxu0 }
  0xfe   : > { %v1015_v18 = vmul.f32 0.35355338, %v880_v15  ;;  %v946_v19 = vpop.f32.mrf.mxu1 }
  0xff   : > { %v6543_v21 = vadd.f32 %v5480_v10, %v946_v19  ;;  %v882_v22 = vpop.f32.mrf.mxu0 }
 0x100   : > { %v6545_v23 = vadd.f32 %v5476_v11, %v882_v22  ;;  %v5942_v24 = vpop.f32.mrf.mxu1 }
 0x101   : > { %1170 = vrot.lane.b32.xlu0 %v944_v13, %s6315_s30  ;;  %1017 = vrot.lane.b32.xlu1 %v1015_v18, %s6314_s19  ;;  %v5934_v25 = vpop.f32.mrf.mxu0 }
 0x105   : > { %1020 = vrot.lane.b32.xlu0 %v1015_v18, %s6315_s30  ;;  %1023 = vrot.lane.b32.xlu1 %v1015_v18, %s6313_s1 }
 0x16f   : > { %v1174_v34 = vpop.permute.xlu1 %1173  ;;  %v1168_v35 = vpop.permute.xlu0 %1167 }
 0x170   : > { %v1192_v38 = vcombine.low %v1168_v35, %v1174_v34  ;;  %v1193_v39 = vcombine.high %v1168_v35, %v1174_v34 }
 0x172   : > { %v1200_v45 = vrot.slane %v1192_v38, %v6560_v37  ;;  %v1207_v46 = vrot.slane %v1193_v39, %v6560_v37 }
 0x173   : > { %v1171_v40 = vpop.permute.xlu0 %1170  ;;  %v1018_v41 = vpop.permute.xlu1 %1017 }
 0x174   : > { %v1176_v42 = vcombine.low %v944_v13, %v1171_v40  ;;  %v1177_v43 = vcombine.high %v944_v13, %v1171_v40 }
 0x176   : > { %v1184_v47 = vrot.slane %v1176_v42, %v6560_v37  ;;  %v1191_v48 = vrot.slane %v1177_v43, %v6560_v37 }
 0x177   : > { %v1021_v49 = vpop.permute.xlu0 %1020  ;;  %v1024_v50 = vpop.permute.xlu1 %1023 }
 0x178   : > { %v1208_v51 = vcombine.low %v1184_v47, %v1200_v45  ;;  %v1209_v52 = vcombine.high %v1184_v47, %v1200_v45  ;;  %v1224_v53 = vcombine.low %v1191_v48, %v1207_v46  ;;  %v1225_v54 = vcombine.high %v1191_v48, %v1207_v46 }
 0x179   : > { %v1026_v55 = vcombine.low %v1015_v18, %v1021_v49  ;;  %v1027_v56 = vcombine.high %v1015_v18, %v1021_v49  ;;  %v1042_v57 = vcombine.low %v1018_v41, %v1024_v50  ;;  %v1043_v58 = vcombine.high %v1018_v41, %v1024_v50 }
 0x17a   : > { %v1216_v59 = vrot.slane %v1208_v51, %v6563_v44  ;;  %v1223_v60 = vrot.slane %v1209_v52, %v6563_v44  ;;  %v1232_v61 = vrot.slane %v1224_v53, %v6563_v44  ;;  %v1239_v62 = vrot.slane %v1225_v54, %v6563_v44 }
 0x17b   : > { %v1034_v63 = vrot.slane %v1026_v55, %v6560_v37  ;;  %v1041_v0 = vrot.slane %v1027_v56, %v6560_v37  ;;  %v1050_v1 = vrot.slane %v1042_v57, %v6560_v37  ;;  %v1057_v2 = vrot.slane %v1043_v58, %v6560_v37 }
 0x17c   : > { %v1244_v4 = vcombine.low %v1216_v59, %v1223_v60  ;;  %v5490_v5 = vcombine.high %v1216_v59, %v1223_v60  ;;  %v1260_v6 = vcombine.low %v1232_v61, %v1239_v62  ;;  %v5491_v7 = vcombine.high %v1232_v61, %v1239_v62 }
 0x17d   : > { %v1058_v8 = vcombine.low %v1034_v63, %v1050_v1  ;;  %v1059_v9 = vcombine.high %v1034_v63, %v1050_v1  ;;  %v1074_v10 = vcombine.low %v1041_v0, %v1057_v2  ;;  %v1075_v11 = vcombine.high %v1041_v0, %v1057_v2 }
 0x17e   : > { %v1251_v12 = vrot.slane %v1244_v4, %v6560_v37  ;;  %v1259_v13 = vrot.slane %v5490_v5, %v6560_v37  ;;  %v1267_v14 = vrot.slane %v1260_v6, %v6560_v37  ;;  %v1275_v15 = vrot.slane %v5491_v7, %v6560_v37  ;;  %v1007_v6 = vpop.f32.mrf.mxu0  ;;  %v5484_v7 = vld [vmem:[%s7307_s24] ss:$0 sm:$0xff] }
 0x17f   : > { %v1066_v16 = vrot.slane %v1058_v8, %v6563_v44  ;;  %v1073_v17 = vrot.slane %v1059_v9, %v6563_v44  ;;  %v1082_v18 = vrot.slane %v1074_v10, %v6563_v44  ;;  %v1089_v19 = vrot.slane %v1075_v11, %v6563_v44 }
 0x180   : > { %v1276_v20 = vcombine.low %v1251_v12, %v1259_v13  ;;  %v1292_v22 = vcombine.low %v1267_v14, %v1275_v15  ;;  %v1277_v24 = vcombine.high %v1251_v12, %v1259_v13  ;;  %v1293_v25 = vcombine.high %v1267_v14, %v1275_v15  ;;  %v5949_v8 = vpop.f32.mrf.mxu0  ;;  %v6630_v13 = vld [vmem:[%s7308_s12] sm:$0x3] }
 0x181   : > { %v1094_v26 = vcombine.low %v1066_v16, %v1073_v17  ;;  %v5488_v27 = vcombine.high %v1066_v16, %v1073_v17  ;;  %v1110_v28 = vcombine.low %v1082_v18, %v1089_v19  ;;  %v5489_v29 = vcombine.high %v1082_v18, %v1089_v19 }
 0x182   : > { %v1284_v30 = vrot.slane %v1276_v20, %v6563_v44  ;;  %v1300_v31 = vrot.slane %v1292_v22, %v6563_v44  ;;  %v1291_v40 = vrot.slane %v1277_v24, %v6563_v44  ;;  %v1307_v41 = vrot.slane %v1293_v25, %v6563_v44  ;;  %v1010_v9 = vpop.f32.mrf.mxu0 }
 0x183   : > { %v1101_v32 = vrot.slane %v1094_v26, %v6560_v37  ;;  %v1109_v34 = vrot.slane %v5488_v27, %v6560_v37  ;;  %v1117_v35 = vrot.slane %v1110_v28, %v6560_v37  ;;  %v1125_v36 = vrot.slane %v5489_v29, %v6560_v37 }
 0x184   : > { %v1308_v38 = vcombine.low %v1284_v30, %v1300_v31  ;;  %v1309_v39 = vcombine.high %v1284_v30, %v1300_v31  ;;  %v1310_v51 = vcombine.low %v1291_v40, %v1307_v41  ;;  %v1311_v52 = vcombine.high %v1291_v40, %v1307_v41  ;;  %v5950_v11 = vpop.f32.mrf.mxu0 }
 0x185   : > { %v1126_v42 = vcombine.low %v1101_v32, %v1109_v34  ;;  %v1142_v43 = vcombine.low %v1117_v35, %v1125_v36  ;;  %v1127_v53 = vcombine.high %v1101_v32, %v1109_v34  ;;  %v1143_v54 = vcombine.high %v1117_v35, %v1125_v36 }
 0x186   : > { %v1312_v45 = vpack.c.bf16 %v1308_v38, %v1308_v38  ;;  %v1313_v46 = vpack.c.bf16 %v1309_v39, %v1309_v39  ;;  %v1314_v57 = vpack.c.bf16 %v1310_v51, %v1310_v51  ;;  %v1315_v58 = vpack.c.bf16 %v1311_v52, %v1311_v52 }
 0x187   : > { %v1134_v47 = vrot.slane %v1126_v42, %v6563_v44  ;;  %v1150_v48 = vrot.slane %v1142_v43, %v6563_v44  ;;  %v1141_v61 = vrot.slane %v1127_v53, %v6563_v44  ;;  %v1157_v62 = vrot.slane %v1143_v54, %v6563_v44 }
 0x188   : > { %v1475_v49 = vsel %vm1470_vm3, %v1312_v45, 0  ;;  %v1521_v50 = vsel %vm1470_vm3, %v1313_v46, 0  ;;  %v1567_v63 = vsel %vm1470_vm3, %v1314_v57, 0  ;;  %v1613_v0 = vsel %vm1470_vm3, %v1315_v58, 0 }
 0x189   : > { %5952 = vmatpush3.bf16.xpose.msra.mxu1 %v1475_v49  ;;  %5958 = vmatpush3.bf16.xpose.msra.mxu0 %v1521_v50  ;;  %v1158_v55 = vcombine.low %v1134_v47, %v1150_v48  ;;  %v1159_v56 = vcombine.high %v1134_v47, %v1150_v48  ;;  %v1160_v1 = vcombine.low %v1141_v61, %v1157_v62  ;;  %v6625_v12 = vsub.s32 0, %v6557_v33 }
 0x18a   : > { %5963 = vmatprep.subr.bf16.mxu1 %v6311_v3  ;;  %5969 = vmatprep.subr.bf16.mxu0 %v6311_v3  ;;  %v1161_v2 = vcombine.high %v1141_v61, %v1157_v62  ;;  %v6622_v10 = vadd.f32 %v5484_v7, %v1010_v9  ;;  %v1008_v43 = vadd.f32 %v5484_v7, %v1007_v6  ;;  %v6648_v45 = vmul.f32 0.35355338, %v6545_v23 }
 0x18b   : > { %v1162_v59 = vpack.c.bf16 %v1158_v55, %v1158_v55  ;;  %v1163_v60 = vpack.c.bf16 %v1159_v56, %v1159_v56  ;;  %v1164_v4 = vpack.c.bf16 %v1160_v1, %v1160_v1  ;;  %v1469_v14 = vrot.slane %v6630_v13, %v6625_v12 }
 0x18c   : > { %v1165_v5 = vpack.c.bf16 %v1161_v2, %v1161_v2 }
 0x190   : > { %5954 = vmatmul.mubr.msk.bf16.vlgmr.msra.gmra.mxu1 %vm1470_vm3, %v1162_v59  ;;  %5960 = vmatmul.mubr.msk.bf16.vlgmr.msra.gmra.mxu0 %vm1470_vm3, %v1163_v60 }
 0x191   : > { %5964 = vmatpush3.bf16.xpose.msra.mxu1 %v1567_v63  ;;  %5970 = vmatpush3.bf16.xpose.msra.mxu0 %v1613_v0 }
 0x192   : > { %5965 = vmatprep.mubr.msk.bf16.mxu1 %vm6312_vm1, %v6311_v3  ;;  %5971 = vmatprep.mubr.msk.bf16.mxu0 %vm6312_vm1, %v6311_v3 }
 0x193   : > { %5975 = vmatprep.subr.bf16.mxu1 %v6311_v3  ;;  %5981 = vmatprep.subr.bf16.mxu0 %v6311_v3 }
 0x198   : > { %5966 = vmatmul.mubr.msk.bf16.vlgmr.msra.gmra.mxu1 %vm1470_vm3, %v1164_v4  ;;  %5972 = vmatmul.mubr.msk.bf16.vlgmr.msra.gmra.mxu0 %vm1470_vm3, %v1165_v5 }
 0x199   : > { %5977 = vmatprep.mubr.msk.bf16.mxu1 %vm6312_vm1, %v6311_v3  ;;  %5983 = vmatprep.mubr.msk.bf16.mxu0 %vm6312_vm1, %v6311_v3 }
 0x250   : > { %v1511_v15 = vpop.f32.mrf.mxu1  ;;  %v1557_v16 = vpop.f32.mrf.mxu0 }
 0x251   : > { %v1512_v17 = vadd.f32 %v1511_v15, %v1469_v14  ;;  %v1558_v18 = vadd.f32 %v1557_v16, %v1469_v14 }
 0x252   : > { %v5955_v19 = vpop.f32.mrf.mxu1  ;;  %v5961_v20 = vpop.f32.mrf.mxu0 }
 0x253   : > { %v1655_v22 = vsel %vm1470_vm3, %v1512_v17, -inf  ;;  %v1658_v24 = vsel %vm1470_vm3, %v1558_v18, -inf }
 0x254   : > { %1656 = vmax.xlane.f32.xlu0 %v1655_v22  ;;  %v1514_v25 = vpop.f32.mrf.mxu1  ;;  %1659 = vmax.xlane.f32.xlu1 %v1658_v24  ;;  %v1560_v26 = vpop.f32.mrf.mxu0 }
 0x256   : > { %v5956_v27 = vpop.f32.mrf.mxu1  ;;  %v5962_v28 = vpop.f32.mrf.mxu0 }
 0x258   : > { %v1603_v29 = vpop.f32.mrf.mxu1  ;;  %v1649_v30 = vpop.f32.mrf.mxu0 }
 0x259   : > { %v1604_v31 = vadd.f32 %v1603_v29, %v1469_v14  ;;  %v1650_v35 = vadd.f32 %v1649_v30, %v1469_v14 }
 0x25a   : > { %v5967_v32 = vpop.f32.mrf.mxu1  ;;  %v5973_v34 = vpop.f32.mrf.mxu0 }
 0x25b   : > { %v1661_v36 = vsel %vm1470_vm3, %v1604_v31, -inf  ;;  %v1664_v42 = vsel %vm1470_vm3, %v1650_v35, -inf }
 0x25c   : > { %1662 = vmax.xlane.f32.xlu0 %v1661_v36  ;;  %v1606_v38 = vpop.f32.mrf.mxu1  ;;  %v1652_v39 = vpop.f32.mrf.mxu0 }
 0x25e   : > { %v5968_v40 = vpop.f32.mrf.mxu1  ;;  %v5974_v41 = vpop.f32.mrf.mxu0 }
 0x260   : > { %1665 = vmax.xlane.f32.xlu0 %v1664_v42 }
 0x265   : > { %1317 = vrot.lane.b32.xlu1 %v1008_v43, %s6314_s19 }
 0x269   : > { %1323 = vrot.lane.b32.xlu1 %v1008_v43, %s6313_s1 }
 0x26d   : > { %2196 = vrot.lane.b32.xlu1 %v6543_v21, %s6315_s30 }
 0x271   : > { %2199 = vrot.lane.b32.xlu1 %v6543_v21, %s6313_s1 }
 0x276   : > { %1320 = vrot.lane.b32.xlu0 %v1008_v43, %s6315_s30 }
 0x27a   : > { %2193 = vrot.lane.b32.xlu0 %v6543_v21, %s6314_s19 }
 0x27e   : > { %2043 = vrot.lane.b32.xlu0 %v6648_v45, %s6314_s19 }
 0x2dd   : > { %v1657_v46 = vpop.xlane.xlu0 %1656  ;;  %v1660_v47 = vpop.xlane.xlu1 %1659 }
 0x2de   : > { %v1667_v48 = vsub.f32 %v1512_v17, %v1657_v46  ;;  %v1668_v49 = vsub.f32 %v1558_v18, %v1660_v47 }
 0x2e0   : > { %v1671_v50 = vmul.f32 1.442695, %v1667_v48  ;;  %v1673_v51 = vmul.f32 1.442695, %v1668_v49 }
 0x2e1   : > { %v1318_v52 = vpop.permute.xlu1 %1317 }
 0x2e2   : > { %6233 = vpow2.f32 %v1671_v50 }
 0x2e3   : > { %6235 = vpow2.f32 %v1673_v51 }
 0x2e5   : > { %v1663_v53 = vpop.xlane.xlu0 %1662  ;;  %v1324_v56 = vpop.permute.xlu1 %1323 }
 0x2e6   : > { %v1669_v54 = vsub.f32 %v1604_v31, %v1663_v53  ;;  %v1342_v58 = vcombine.low %v1318_v52, %v1324_v56  ;;  %v1343_v59 = vcombine.high %v1318_v52, %v1324_v56 }
 0x2e8   : > { %v1675_v55 = vmul.f32 1.442695, %v1669_v54  ;;  %v1350_v1 = vrot.slane %v1342_v58, %v6560_v37  ;;  %v1357_v4 = vrot.slane %v1343_v59, %v6560_v37 }
 0x2e9   : > { %v1666_v57 = vpop.xlane.xlu0 %1665  ;;  %v2197_v54 = vpop.permute.xlu1 %2196 }
 0x2ea   : > { %6237 = vpow2.f32 %v1675_v55  ;;  %v1670_v23 = vsub.f32 %v1650_v35, %v1666_v57  ;;  %v2202_v58 = vcombine.low %v6543_v21, %v2197_v54  ;;  %v2203_v59 = vcombine.high %v6543_v21, %v2197_v54 }
 0x2ec   : > { %v1677_v60 = vmul.f32 1.442695, %v1670_v23 }
 0x2ed   : > { %v1321_v61 = vpop.permute.xlu0 %1320  ;;  %v2200_v56 = vpop.permute.xlu1 %2199 }
 0x2ee   : > { %6239 = vpow2.f32 %v1677_v60  ;;  %v1326_v62 = vcombine.low %v1008_v43, %v1321_v61  ;;  %v1327_v63 = vcombine.high %v1008_v43, %v1321_v61 }
 0x2ef   : > { %v6652_v0 = vpop.eup %6233 }
 0x2f0   : > { %v6655_v2 = vpop.eup %6235  ;;  %v1334_v5 = vrot.slane %v1326_v62, %v6560_v37  ;;  %v1341_v6 = vrot.slane %v1327_v63, %v6560_v37  ;;  %v1679_v7 = vsel %vm1470_vm3, %v6652_v0, 0.0  ;;  %v2210_v62 = vrot.slane %v2202_v58, %v6560_v37 }
 0x2f1   : > { %1680 = vadd.xlane.f32.xlu1 %v1679_v7  ;;  %v1682_v8 = vsel %vm1470_vm3, %v6655_v2, 0.0  ;;  %v2194_v55 = vpop.permute.xlu0 %2193  ;;  %v2217_v63 = vrot.slane %v2203_v59, %v6560_v37 }
 0x2f2   : > { %v1358_v9 = vcombine.low %v1334_v5, %v1350_v1  ;;  %v1359_v11 = vcombine.high %v1334_v5, %v1350_v1  ;;  %v1374_v14 = vcombine.low %v1341_v6, %v1357_v4  ;;  %v1375_v15 = vcombine.high %v1341_v6, %v1357_v4  ;;  %1683 = vadd.xlane.f32.xlu0 %v1682_v8 }
 0x2f3   : > { %v2218_v57 = vcombine.low %v2194_v55, %v2200_v56  ;;  %v2219_v23 = vcombine.high %v2194_v55, %v2200_v56 }
 0x2f4   : > { %v1366_v16 = vrot.slane %v1358_v9, %v6563_v44  ;;  %v1373_v17 = vrot.slane %v1359_v11, %v6563_v44  ;;  %v1382_v18 = vrot.slane %v1374_v14, %v6563_v44  ;;  %v1389_v19 = vrot.slane %v1375_v15, %v6563_v44 }
 0x2f5   : > { %v2226_v60 = vrot.slane %v2218_v57, %v6560_v37  ;;  %v2233_v61 = vrot.slane %v2219_v23, %v6560_v37  ;;  %v2044_v4 = vpop.permute.xlu0 %2043 }
 0x2f6   : > { %v1394_v20 = vcombine.low %v1366_v16, %v1373_v17  ;;  %v5492_v22 = vcombine.high %v1366_v16, %v1373_v17  ;;  %v1410_v24 = vcombine.low %v1382_v18, %v1389_v19  ;;  %v5493_v25 = vcombine.high %v1382_v18, %v1389_v19 }
 0x2f7   : > { %v6668_v26 = vpop.eup %6237  ;;  %v2234_v1 = vcombine.low %v2210_v62, %v2226_v60  ;;  %v2235_v5 = vcombine.high %v2210_v62, %v2226_v60  ;;  %v2250_v6 = vcombine.low %v2217_v63, %v2233_v61  ;;  %v2251_v7 = vcombine.high %v2217_v63, %v2233_v61 }
 0x2f8   : > { %v1401_v27 = vrot.slane %v1394_v20, %v6560_v37  ;;  %v1409_v28 = vrot.slane %v5492_v22, %v6560_v37  ;;  %v1417_v29 = vrot.slane %v1410_v24, %v6560_v37  ;;  %v1425_v30 = vrot.slane %v5493_v25, %v6560_v37 }
 0x2f9   : > { %v1685_v31 = vsel %vm1470_vm3, %v6668_v26, 0.0  ;;  %v2242_v9 = vrot.slane %v2234_v1, %v6563_v44  ;;  %v2249_v21 = vrot.slane %v2235_v5, %v6563_v44  ;;  %v2258_v14 = vrot.slane %v2250_v6, %v6563_v44 }
 0x2fa   : > { %v1426_v32 = vcombine.low %v1401_v27, %v1409_v28  ;;  %v1442_v34 = vcombine.low %v1417_v29, %v1425_v30  ;;  %v1427_v35 = vcombine.high %v1401_v27, %v1409_v28  ;;  %1686 = vadd.xlane.f32.xlu1 %v1685_v31  ;;  %v1443_v46 = vcombine.high %v1417_v29, %v1425_v30 }
 0x2fb   : > { %v6676_v36 = vpop.eup %6239  ;;  %v2265_v15 = vrot.slane %v2251_v7, %v6563_v44  ;;  %v2270_v16 = vcombine.low %v2242_v9, %v2249_v21  ;;  %v5506_v17 = vcombine.high %v2242_v9, %v2249_v21 }
 0x2fc   : > { %v1688_v38 = vsel %vm1470_vm3, %v6676_v36, 0.0  ;;  %v1434_v39 = vrot.slane %v1426_v32, %v6563_v44  ;;  %v1450_v40 = vrot.slane %v1442_v34, %v6563_v44  ;;  %v1441_v43 = vrot.slane %v1427_v35, %v6563_v44 }
 0x2fd   : > { %1689 = vadd.xlane.f32.xlu0 %v1688_v38  ;;  %v1457_v49 = vrot.slane %v1443_v46, %v6563_v44  ;;  %v2286_v18 = vcombine.low %v2258_v14, %v2265_v15  ;;  %v5507_v19 = vcombine.high %v2258_v14, %v2265_v15  ;;  %v2277_v20 = vrot.slane %v2270_v16, %v6560_v37 }
 0x2fe   : > { %v1458_v41 = vcombine.low %v1434_v39, %v1450_v40  ;;  %v1459_v42 = vcombine.high %v1434_v39, %v1450_v40  ;;  %v2285_v22 = vrot.slane %v5506_v17, %v6560_v37 }
 0x2ff   : > { %v6686_v52 = vcombine.low %v1441_v43, %v1457_v49  ;;  %v6688_v53 = vcombine.high %v1441_v43, %v1457_v49  ;;  %v2293_v24 = vrot.slane %v2286_v18, %v6560_v37  ;;  %v2301_v25 = vrot.slane %v5507_v19, %v6560_v37 }
 0x300   : > { %v1462_v47 = vpack.c.bf16 %v1458_v41, %v1458_v41  ;;  %v1463_v48 = vpack.c.bf16 %v1459_v42, %v1459_v42  ;;  %v2302_v31 = vcombine.low %v2277_v20, %v2285_v22  ;;  %v2303_v59 = vcombine.high %v2277_v20, %v2285_v22 }
 0x301   : > { %v2318_v32 = vcombine.low %v2293_v24, %v2301_v25  ;;  %v1464_v42 = vpack.c.bf16 %v6686_v52, %v6686_v52  ;;  %v1465_v43 = vpack.c.bf16 %v6688_v53, %v6688_v53  ;;  %v2319_v60 = vcombine.high %v2293_v24, %v2301_v25 }
 0x302   : > { %v1708_v50 = vsel %vm1706_vm4, %v1462_v47, 0  ;;  %v1754_v51 = vsel %vm1706_vm4, %v1463_v48, 0  ;;  %v2317_v15 = vrot.slane %v2303_v59, %v6563_v44 }
 0x303   : > { %5976 = vmatpush3.bf16.msra.mxu1 %v1708_v50  ;;  %5982 = vmatpush3.bf16.msra.mxu0 %v1754_v51  ;;  %v2310_v50 = vrot.slane %v2302_v31, %v6563_v44  ;;  %v2326_v51 = vrot.slane %v2318_v32, %v6563_v44  ;;  %v1800_v52 = vsel %vm1706_vm4, %v1464_v42, 0  ;;  %v1846_v53 = vsel %vm1706_vm4, %v1465_v43, 0 }
 0x304   : > { %5987 = vmatprep.subr.bf16.mxu1 %v6311_v3  ;;  %5993 = vmatprep.subr.bf16.mxu0 %v6311_v3  ;;  %v2333_v16 = vrot.slane %v2319_v60, %v6563_v44 }
 0x305   : > { %v2334_v58 = vcombine.low %v2310_v50, %v2326_v51  ;;  %v2335_v5 = vcombine.high %v2310_v50, %v2326_v51 }
 0x307   : > { %v2338_v14 = vpack.c.bf16 %v2334_v58, %v2334_v58  ;;  %v2339_v25 = vpack.c.bf16 %v2335_v5, %v2335_v5 }
 0x30b   : > { %2046 = vrot.lane.b32.xlu1 %v6648_v45, %s6315_s30 }
 0x313   : > { %2049 = vrot.lane.b32.xlu0 %v6648_v45, %s6313_s1 }
 0x37a   : > { %v1681_v8 = vpop.xlane.xlu1 %1680 }
 0x37b   : > { %6241 = vrcp.f32 %v1681_v8  ;;  %v1684_v11 = vpop.xlane.xlu0 %1683 }
 0x37c   : > { %6243 = vrcp.f32 %v1684_v11 }
 0x383   : > { %v1687_v27 = vpop.xlane.xlu1 %1686 }
 0x384   : > { %6245 = vrcp.f32 %v1687_v27 }
 0x386   : > { %v1690_v28 = vpop.xlane.xlu0 %1689 }
 0x387   : > { %6247 = vrcp.f32 %v1690_v28  ;;  %v2047_v30 = vpop.permute.xlu1 %2046 }
 0x388   : > { %v6242_v29 = vpop.eup %6241  ;;  %v2052_v35 = vcombine.low %v6648_v45, %v2047_v30  ;;  %v2053_v38 = vcombine.high %v6648_v45, %v2047_v30  ;;  %v2336_v30 = vcombine.low %v2317_v15, %v2333_v16 }
 0x389   : > { %v6244_v34 = vpop.eup %6243  ;;  %v1695_v39 = vmul.f32 %v6242_v29, %v6652_v0 }
 0x38a   : > { %v2050_v40 = vpop.permute.xlu0 %2049  ;;  %v1696_v41 = vmul.f32 %v6244_v34, %v6655_v2  ;;  %v2060_v45 = vrot.slane %v2052_v35, %v6560_v37  ;;  %v2067_v0 = vrot.slane %v2053_v38, %v6560_v37  ;;  %v2337_v38 = vcombine.high %v2317_v15, %v2333_v16 }
 0x38b   : > { %v2068_v46 = vcombine.low %v2044_v4, %v2050_v40  ;;  %v2069_v47 = vcombine.high %v2044_v4, %v2050_v40  ;;  %v1699_v48 = vpack.c.bf16 %v1695_v39, %v1695_v39  ;;  %v2340_v40 = vpack.c.bf16 %v2336_v30, %v2336_v30 }
 0x38c   : > { %v1700_v49 = vpack.c.bf16 %v1696_v41, %v1696_v41  ;;  %v2341_v43 = vpack.c.bf16 %v2337_v38, %v2337_v38 }
 0x38d   : > { %v2076_v2 = vrot.slane %v2068_v46, %v6560_v37  ;;  %v2083_v54 = vrot.slane %v2069_v47, %v6560_v37  ;;  %5978 = vmatmul.mubr.msk.bf16.vlgmr.msra.gmra.mxu1 %vm1470_vm3, %v1699_v48  ;;  %v2592_v48 = vsel %vm1470_vm3, %v2340_v40, 0 }
 0x38e   : > { %5984 = vmatmul.mubr.msk.bf16.vlgmr.msra.gmra.mxu0 %vm1470_vm3, %v1700_v49  ;;  %5988 = vmatpush3.bf16.msra.mxu1 %v1800_v52  ;;  %v2638_v50 = vsel %vm1470_vm3, %v2341_v43, 0 }
 0x38f   : > { %v2084_v55 = vcombine.low %v2060_v45, %v2076_v2  ;;  %v2085_v56 = vcombine.high %v2060_v45, %v2076_v2  ;;  %v2100_v57 = vcombine.low %v2067_v0, %v2083_v54  ;;  %v2101_v23 = vcombine.high %v2067_v0, %v2083_v54  ;;  %5994 = vmatpush3.bf16.msra.mxu0 %v1846_v53 }
 0x390   : > { %5989 = vmatprep.mubr.msk.bf16.mxu1 %vm6312_vm1, %v6311_v3  ;;  %5999 = vmatprep.subr.bf16.mxu1 %v6311_v3 }
 0x391   : > { %v2092_v61 = vrot.slane %v2084_v55, %v6563_v44  ;;  %v2099_v62 = vrot.slane %v2085_v56, %v6563_v44  ;;  %v2108_v63 = vrot.slane %v2100_v57, %v6563_v44  ;;  %v2115_v1 = vrot.slane %v2101_v23, %v6563_v44  ;;  %v6246_v4 = vpop.eup %6245  ;;  %5995 = vmatprep.mubr.msk.bf16.mxu0 %vm6312_vm1, %v6311_v3 }
 0x392   : > { %6005 = vmatprep.subr.bf16.mxu0 %v6311_v3  ;;  %v1697_v21 = vmul.f32 %v6246_v4, %v6668_v26  ;;  %v2500_v26 = vsel %vm1470_vm3, %v2338_v14, 0 }
 0x393   : > { %v2120_v6 = vcombine.low %v2092_v61, %v2099_v62  ;;  %v5504_v7 = vcombine.high %v2092_v61, %v2099_v62  ;;  %v2136_v8 = vcombine.low %v2108_v63, %v2115_v1  ;;  %v5505_v9 = vcombine.high %v2108_v63, %v2115_v1 }
 0x394   : > { %v6248_v11 = vpop.eup %6247  ;;  %v1701_v22 = vpack.c.bf16 %v1697_v21, %v1697_v21  ;;  %v6777_v1 = vsub.s32 1, %v6557_v33 }
 0x395   : > { %v2127_v17 = vrot.slane %v2120_v6, %v6560_v37  ;;  %v2135_v18 = vrot.slane %v5504_v7, %v6560_v37  ;;  %v2143_v19 = vrot.slane %v2136_v8, %v6560_v37  ;;  %v2151_v20 = vrot.slane %v5505_v9, %v6560_v37 }
 0x396   : > { %v1698_v24 = vmul.f32 %v6248_v11, %v6676_v36  ;;  %5990 = vmatmul.mubr.msk.bf16.vlgmr.msra.gmra.mxu1 %vm1470_vm3, %v1701_v22  ;;  %v2546_v36 = vsel %vm1470_vm3, %v2339_v25, 0  ;;  %v2495_v16 = vrot.slane %v6630_v13, %v6777_v1 }
 0x397   : > { %v2152_v27 = vcombine.low %v2127_v17, %v2135_v18  ;;  %v2168_v28 = vcombine.low %v2143_v19, %v2151_v20  ;;  %6000 = vmatpush3.bf16.xpose.msra.mxu1 %v2500_v26  ;;  %6001 = vmatprep.mubr.msk.bf16.mxu1 %vm6312_vm1, %v6311_v3  ;;  %v2153_v34 = vcombine.high %v2127_v17, %v2135_v18 }
 0x398   : > { %v1702_v29 = vpack.c.bf16 %v1698_v24, %v1698_v24  ;;  %v2169_v35 = vcombine.high %v2143_v19, %v2151_v20  ;;  %6011 = vmatprep.subr.bf16.mxu1 %v6311_v3 }
 0x399   : > { %v2160_v31 = vrot.slane %v2152_v27, %v6563_v44  ;;  %v2176_v32 = vrot.slane %v2168_v28, %v6563_v44  ;;  %v2167_v46 = vrot.slane %v2153_v34, %v6563_v44 }
 0x39a   : > { %5996 = vmatmul.mubr.msk.bf16.vlgmr.msra.gmra.mxu0 %vm1470_vm3, %v1702_v29  ;;  %v2183_v47 = vrot.slane %v2169_v35, %v6563_v44 }
 0x39b   : > { %6006 = vmatpush3.bf16.xpose.msra.mxu0 %v2546_v36  ;;  %v2184_v39 = vcombine.low %v2160_v31, %v2176_v32  ;;  %6007 = vmatprep.mubr.msk.bf16.mxu0 %vm6312_vm1, %v6311_v3  ;;  %v2185_v41 = vcombine.high %v2160_v31, %v2176_v32 }
 0x39c   : > { %6017 = vmatprep.subr.bf16.mxu0 %v6311_v3  ;;  %v2186_v51 = vcombine.low %v2167_v46, %v2183_v47  ;;  %v2187_v45 = vcombine.high %v2167_v46, %v2183_v47 }
 0x39d   : > { %v2188_v42 = vpack.c.bf16 %v2184_v39, %v2184_v39  ;;  %v2189_v49 = vpack.c.bf16 %v2185_v41, %v2185_v41 }
 0x39e   : > { %v2190_v0 = vpack.c.bf16 %v2186_v51, %v2186_v51  ;;  %v2191_v2 = vpack.c.bf16 %v2187_v45, %v2187_v45 }
 0x39f   : > { %6002 = vmatmul.mubr.msk.bf16.vlgmr.msra.gmra.mxu1 %vm1470_vm3, %v2188_v42 }
 0x3a0   : > { %6012 = vmatpush3.bf16.xpose.msra.mxu1 %v2592_v48  ;;  %6013 = vmatprep.mubr.msk.bf16.mxu1 %vm6312_vm1, %v6311_v3 }
 0x3a1   : > { %6023 = vmatprep.subr.bf16.mxu1 %v6311_v3 }
 0x3a2   : > { %6008 = vmatmul.mubr.msk.bf16.vlgmr.msra.gmra.mxu0 %vm1470_vm3, %v2189_v49 }
 0x3a3   : > { %6018 = vmatpush3.bf16.xpose.msra.mxu0 %v2638_v50  ;;  %6019 = vmatprep.mubr.msk.bf16.mxu0 %vm6312_vm1, %v6311_v3 }
 0x3a4   : > { %6029 = vmatprep.subr.bf16.mxu0 %v6311_v3 }
 0x3a7   : > { %6014 = vmatmul.mubr.msk.bf16.vlgmr.msra.gmra.mxu1 %vm1470_vm3, %v2190_v0 }
 0x3a8   : > { %6025 = vmatprep.mubr.msk.bf16.mxu1 %vm6312_vm1, %v6311_v3 }
 0x3aa   : > { %6020 = vmatmul.mubr.msk.bf16.vlgmr.msra.gmra.mxu0 %vm1470_vm3, %v2191_v2 }
 0x3ab   : > { %6031 = vmatprep.mubr.msk.bf16.mxu0 %vm6312_vm1, %v6311_v3 }
 0x44d   : > { %v1744_v54 = vpop.f32.mrf.mxu1 }
 0x44e   : > { %v1790_v52 = vpop.f32.mrf.mxu0 }
 0x44f   : > { %v5979_v53 = vpop.f32.mrf.mxu1 }
 0x450   : > { %v5985_v55 = vpop.f32.mrf.mxu0 }
 0x451   : > { %v1747_v56 = vpop.f32.mrf.mxu1 }
 0x452   : > { %v1793_v57 = vpop.f32.mrf.mxu0 }
 0x453   : > { %v5980_v23 = vpop.f32.mrf.mxu1 }
 0x454   : > { %v5986_v58 = vpop.f32.mrf.mxu0 }
 0x456   : > { %v1836_v59 = vpop.f32.mrf.mxu1 }
 0x457   : > { %v1888_v60 = vcombine.low %v1744_v54, %v1836_v59  ;;  %v1889_v61 = vcombine.high %v1744_v54, %v1836_v59 }
 0x458   : > { %v5991_v62 = vpop.f32.mrf.mxu1 }
 0x459   : > { %v1896_v8 = vrot.slane %v1888_v60, %v6560_v37  ;;  %v1903_v9 = vrot.slane %v1889_v61, %v6560_v37 }
 0x45a   : > { %v1882_v63 = vpop.f32.mrf.mxu0  ;;  %v1839_v6 = vpop.f32.mrf.mxu1 }
 0x45b   : > { %v1904_v4 = vcombine.low %v1790_v52, %v1882_v63  ;;  %v1905_v5 = vcombine.high %v1790_v52, %v1882_v63 }
 0x45c   : > { %v5997_v7 = vpop.f32.mrf.mxu0  ;;  %v5992_v14 = vpop.f32.mrf.mxu1 }
 0x45d   : > { %v1912_v11 = vrot.slane %v1904_v4, %v6560_v37  ;;  %v1919_v21 = vrot.slane %v1905_v5, %v6560_v37 }
 0x45e   : > { %v1885_v15 = vpop.f32.mrf.mxu0 }
 0x45f   : > { %v1920_v17 = vcombine.low %v1896_v8, %v1912_v11  ;;  %v1921_v18 = vcombine.high %v1896_v8, %v1912_v11  ;;  %v1936_v19 = vcombine.low %v1903_v9, %v1919_v21  ;;  %v1937_v20 = vcombine.high %v1903_v9, %v1919_v21  ;;  %v2536_v24 = vpop.f32.mrf.mxu1 }
 0x460   : > { %v5998_v22 = vpop.f32.mrf.mxu0  ;;  %v2537_v29 = vadd.f32 %v2536_v24, %v2495_v16 }
 0x461   : > { %v1928_v25 = vrot.slane %v1920_v17, %v6563_v44  ;;  %v1935_v27 = vrot.slane %v1921_v18, %v6563_v44  ;;  %v1944_v28 = vrot.slane %v1936_v19, %v6563_v44  ;;  %v1951_v26 = vrot.slane %v1937_v20, %v6563_v44  ;;  %v6003_v30 = vpop.f32.mrf.mxu1 }
 0x462   : > { %v2582_v31 = vpop.f32.mrf.mxu0  ;;  %v2680_v38 = vsel %vm1470_vm3, %v2537_v29, -inf }
 0x463   : > { %v1956_v32 = vcombine.low %v1928_v25, %v1935_v27  ;;  %v5502_v34 = vcombine.high %v1928_v25, %v1935_v27  ;;  %v1972_v13 = vcombine.low %v1944_v28, %v1951_v26  ;;  %v5503_v35 = vcombine.high %v1944_v28, %v1951_v26  ;;  %v2539_v39 = vpop.f32.mrf.mxu1  ;;  %2681 = vmax.xlane.f32.xlu1 %v2680_v38 }
 0x464   : > { %v2583_v36 = vadd.f32 %v2582_v31, %v2495_v16  ;;  %v6009_v40 = vpop.f32.mrf.mxu0 }
 0x465   : > { %v1963_v41 = vrot.slane %v1956_v32, %v6560_v37  ;;  %v1971_v42 = vrot.slane %v5502_v34, %v6560_v37  ;;  %v1979_v43 = vrot.slane %v1972_v13, %v6560_v37  ;;  %v1987_v46 = vrot.slane %v5503_v35, %v6560_v37  ;;  %v6004_v47 = vpop.f32.mrf.mxu1 }
 0x466   : > { %v2683_v48 = vsel %vm1470_vm3, %v2583_v36, -inf  ;;  %v2585_v49 = vpop.f32.mrf.mxu0 }
 0x467   : > { %2684 = vmax.xlane.f32.xlu0 %v2683_v48  ;;  %v1989_v50 = vcombine.high %v1963_v41, %v1971_v42  ;;  %v2005_v51 = vcombine.high %v1979_v43, %v1987_v46  ;;  %v1988_v45 = vcombine.low %v1963_v41, %v1971_v42  ;;  %v2004_v0 = vcombine.low %v1979_v43, %v1987_v46  ;;  %v2628_v54 = vpop.f32.mrf.mxu1 }
 0x468   : > { %v6010_v2 = vpop.f32.mrf.mxu0  ;;  %v2629_v52 = vadd.f32 %v2628_v54, %v2495_v16 }
 0x469   : > { %v6796_v53 = vrot.slane %v1989_v50, %v6563_v44  ;;  %v6799_v55 = vrot.slane %v2005_v51, %v6563_v44  ;;  %v6802_v56 = vrot.slane %v1988_v45, %v6563_v44  ;;  %v6015_v57 = vpop.f32.mrf.mxu1  ;;  %v6805_v58 = vrot.slane %v2004_v0, %v6563_v44 }
 0x46a   : > { %v2674_v23 = vpop.f32.mrf.mxu0  ;;  %v2686_v60 = vsel %vm1470_vm3, %v2629_v52, -inf }
 0x46b   : > { %v2675_v59 = vadd.f32 %v2674_v23, %v2495_v16  ;;  %v2022_v61 = vcombine.low %v6796_v53, %v6799_v55  ;;  %v2023_v62 = vcombine.high %v6796_v53, %v6799_v55  ;;  %v2631_v63 = vpop.f32.mrf.mxu1  ;;  %2687 = vmax.xlane.f32.xlu0 %v2686_v60  ;;  %v2020_v5 = vcombine.low %v6802_v56, %v6805_v58 }
 0x46c   : > { %v6021_v4 = vpop.f32.mrf.mxu0  ;;  %v2021_v6 = vcombine.high %v6802_v56, %v6805_v58  ;;  %v5520_v56 = vld [vmem:[%s7309_s26] ss:$0 sm:$0xff] }
 0x46d   : > { %v2689_v7 = vsel %vm1470_vm3, %v2675_v59, -inf  ;;  %v6016_v8 = vpop.f32.mrf.mxu1 }
 0x46e   : > { %2690 = vmax.xlane.f32.xlu1 %v2689_v7  ;;  %v2677_v9 = vpop.f32.mrf.mxu0 }
 0x470   : > { %v6022_v11 = vpop.f32.mrf.mxu0 }
 0x47f   : > { %2346 = vrot.lane.b32.xlu1 %v6622_v10, %s6315_s30 }
 0x4ec   : > { %v2682_v21 = vpop.xlane.xlu1 %2681 }
 0x4ed   : > { %v2692_v14 = vsub.f32 %v2537_v29, %v2682_v21 }
 0x4ef   : > { %v2696_v16 = vmul.f32 1.442695, %v2692_v14 }
 0x4f0   : > { %v2685_v15 = vpop.xlane.xlu0 %2684 }
 0x4f1   : > { %v2693_v17 = vsub.f32 %v2583_v36, %v2685_v15  ;;  %6249 = vpow2.f32 %v2696_v16 }
 0x4f3   : > { %v2698_v18 = vmul.f32 1.442695, %v2693_v17 }
 0x4f4   : > { %v2688_v25 = vpop.xlane.xlu0 %2687 }
 0x4f5   : > { %6251 = vpow2.f32 %v2698_v18  ;;  %v2694_v28 = vsub.f32 %v2629_v52, %v2688_v25 }
 0x4f7   : > { %v2691_v27 = vpop.xlane.xlu1 %2690  ;;  %v2700_v29 = vmul.f32 1.442695, %v2694_v28 }
 0x4f8   : > { %v2695_v26 = vsub.f32 %v2675_v59, %v2691_v27 }
 0x4f9   : > { %6253 = vpow2.f32 %v2700_v29 }
 0x4fa   : > { %v2702_v30 = vmul.f32 1.442695, %v2695_v26 }
 0x4fb   : > { %v2347_v35 = vpop.permute.xlu1 %2346 }
 0x4fc   : > { %6255 = vpow2.f32 %v2702_v30  ;;  %v2352_v39 = vcombine.low %v6622_v10, %v2347_v35  ;;  %v2353_v40 = vcombine.high %v6622_v10, %v2347_v35 }
 0x4fe   : > { %v6819_v19 = vpop.eup %6249  ;;  %v2360_v47 = vrot.slane %v2352_v39, %v6560_v37  ;;  %v2367_v48 = vrot.slane %v2353_v40, %v6560_v37 }
 0x4ff   : > { %v2704_v20 = vsel %vm1470_vm3, %v6819_v19, 0.0 }
 0x500   : > { %2705 = vadd.xlane.f32.xlu0 %v2704_v20 }
 0x502   : > { %v6823_v22 = vpop.eup %6251 }
 0x503   : > { %v2707_v24 = vsel %vm1470_vm3, %v6823_v22, 0.0 }
 0x504   : > { %2708 = vadd.xlane.f32.xlu1 %v2707_v24 }
 0x506   : > { %v6831_v31 = vpop.eup %6253 }
 0x507   : > { %v2710_v34 = vsel %vm1470_vm3, %v6831_v31, 0.0 }
 0x509   : > { %v6833_v32 = vpop.eup %6255 }
 0x50a   : > { %v2713_v13 = vsel %vm1470_vm3, %v6833_v32, 0.0 }
 0x515   : > { %2349 = vrot.lane.b32.xlu1 %v6622_v10, %s6313_s1 }
 0x516   : > { %2343 = vrot.lane.b32.xlu0 %v6622_v10, %s6314_s19  ;;  %s7310_s19 = scalar_lea.vmem %s7265_s10, %s6431_s29 }
 0x535   : > { %2711 = vadd.xlane.f32.xlu0 %v2710_v34 }
 0x539   : > { %2714 = vadd.xlane.f32.xlu1 %v2713_v13 }
 0x589   : > { %v2706_v36 = vpop.xlane.xlu0 %2705 }
 0x58a   : > { %6257 = vrcp.f32 %v2706_v36 }
 0x58d   : > { %v2709_v38 = vpop.xlane.xlu1 %2708  ;;  %v2344_v41 = vpop.permute.xlu0 %2343 }
 0x58e   : > { %6259 = vrcp.f32 %v2709_v38 }
 0x591   : > { %v2350_v42 = vpop.permute.xlu1 %2349 }
 0x592   : > { %v2368_v43 = vcombine.low %v2344_v41, %v2350_v42  ;;  %v2369_v46 = vcombine.high %v2344_v41, %v2350_v42 }
 0x594   : > { %v2376_v49 = vrot.slane %v2368_v43, %v6560_v37  ;;  %v2383_v50 = vrot.slane %v2369_v46, %v6560_v37 }
 0x596   : > { %v2384_v51 = vcombine.low %v2360_v47, %v2376_v49  ;;  %v2385_v45 = vcombine.high %v2360_v47, %v2376_v49  ;;  %v2400_v0 = vcombine.low %v2367_v48, %v2383_v50  ;;  %v2401_v2 = vcombine.high %v2367_v48, %v2383_v50 }
 0x597   : > { %v6258_v16 = vpop.eup %6257 }
 0x598   : > { %v2392_v10 = vrot.slane %v2384_v51, %v6563_v44  ;;  %v2399_v54 = vrot.slane %v2385_v45, %v6563_v44  ;;  %v2408_v52 = vrot.slane %v2400_v0, %v6563_v44  ;;  %v2415_v57 = vrot.slane %v2401_v2, %v6563_v44 }
 0x599   : > { %v2720_v13 = vmul.f32 %v6258_v16, %v6819_v19 }
 0x59a   : > { %v2420_v23 = vcombine.low %v2392_v10, %v2399_v54  ;;  %v5508_v59 = vcombine.high %v2392_v10, %v2399_v54  ;;  %v2436_v60 = vcombine.low %v2408_v52, %v2415_v57  ;;  %v5509_v63 = vcombine.high %v2408_v52, %v2415_v57 }
 0x59b   : > { %v6260_v25 = vpop.eup %6259  ;;  %v2724_v41 = vpack.c.bf16 %v2720_v13, %v2720_v13 }
 0x59c   : > { %v2427_v4 = vrot.slane %v2420_v23, %v6560_v37  ;;  %v2435_v7 = vrot.slane %v5508_v59, %v6560_v37  ;;  %v2443_v8 = vrot.slane %v2436_v60, %v6560_v37  ;;  %v2451_v9 = vrot.slane %v5509_v63, %v6560_v37 }
 0x59d   : > { %v2721_v35 = vmul.f32 %v6260_v25, %v6823_v22 }
 0x59e   : > { %v2452_v11 = vcombine.low %v2427_v4, %v2435_v7  ;;  %v2468_v21 = vcombine.low %v2443_v8, %v2451_v9  ;;  %v2453_v14 = vcombine.high %v2427_v4, %v2435_v7  ;;  %v2469_v15 = vcombine.high %v2443_v8, %v2451_v9 }
 0x59f   : > { %v2725_v42 = vpack.c.bf16 %v2721_v35, %v2721_v35 }
 0x5a0   : > { %v2460_v17 = vrot.slane %v2452_v11, %v6563_v44  ;;  %v2476_v18 = vrot.slane %v2468_v21, %v6563_v44  ;;  %v2467_v20 = vrot.slane %v2453_v14, %v6563_v44  ;;  %v2483_v24 = vrot.slane %v2469_v15, %v6563_v44 }
 0x5a2   : > { %v2484_v27 = vcombine.low %v2460_v17, %v2476_v18  ;;  %v2485_v28 = vcombine.high %v2460_v17, %v2476_v18  ;;  %v2486_v26 = vcombine.low %v2467_v20, %v2483_v24  ;;  %v2487_v29 = vcombine.high %v2467_v20, %v2483_v24 }
 0x5a4   : > { %v2488_v30 = vpack.c.bf16 %v2484_v27, %v2484_v27  ;;  %v2489_v34 = vpack.c.bf16 %v2485_v28, %v2485_v28  ;;  %v2490_v39 = vpack.c.bf16 %v2486_v26, %v2486_v26  ;;  %v2491_v40 = vpack.c.bf16 %v2487_v29, %v2487_v29 }
 0x5a6   : > { %v2732_v36 = vsel %vm1706_vm4, %v2488_v30, 0  ;;  %v2778_v38 = vsel %vm1706_vm4, %v2489_v34, 0  ;;  %v2824_v19 = vsel %vm1706_vm4, %v2490_v39, 0  ;;  %v2870_v22 = vsel %vm1706_vm4, %v2491_v40, 0  ;;  %v6103_v39 = vld [vmem:[%s6462_s3 + $0x8] sm:$0xff]  }
 0x5a7   : > { %6024 = vmatpush3.bf16.msra.mxu1 %v2732_v36  ;;  %6030 = vmatpush3.bf16.msra.mxu0 %v2778_v38 }
 0x5a8   : > { %6035 = vmatprep.subr.bf16.mxu1 %v6311_v3  ;;  %6041 = vmatprep.subr.bf16.mxu0 %v6311_v3 }
 0x5aa   : > { %6026 = vmatmul.mubr.msk.bf16.vlgmr.msra.gmra.mxu1 %vm1470_vm3, %v2724_v41  ;;  %6032 = vmatmul.mubr.msk.bf16.vlgmr.msra.gmra.mxu0 %vm1470_vm3, %v2725_v42 }
 0x5ab   : > { %6036 = vmatpush3.bf16.msra.mxu1 %v2824_v19  ;;  %6042 = vmatpush3.bf16.msra.mxu0 %v2870_v22 }
 0x5ac   : > { %6037 = vmatprep.mubr.msk.bf16.mxu1 %vm6312_vm1, %v6311_v3  ;;  %6043 = vmatprep.mubr.msk.bf16.mxu0 %vm6312_vm1, %v6311_v3 }
 0x5ad   : > { %6047 = vmatprep.subr.bf16.mxu1 %v6311_v3 }
 0x5be   : > { %v2712_v43 = vpop.xlane.xlu0 %2711 }
 0x5bf   : > { %6261 = vrcp.f32 %v2712_v43 }
 0x5c2   : > { %v2715_v46 = vpop.xlane.xlu1 %2714 }
 0x5c3   : > { %6263 = vrcp.f32 %v2715_v46 }
 0x5cc   : > { %v6262_v47 = vpop.eup %6261 }
 0x5cd   : > { %v2722_v48 = vmul.f32 %v6262_v47, %v6831_v31 }
 0x5cf   : > { %v2726_v50 = vpack.c.bf16 %v2722_v48, %v2722_v48  ;;  %v6104_v48 = vld [vmem:[%s6462_s3] sm:$0xff]   ;;  %s6318_s3 = smov 16  }
 0x5d0   : > { %v6264_v49 = vpop.eup %6263 }
 0x5d1   : > { %v2723_v51 = vmul.f32 %v6264_v49, %v6833_v32  ;;  %6038 = vmatmul.mubr.msk.bf16.vlgmr.msra.gmra.mxu1 %vm1470_vm3, %v2726_v50 }
 0x5d2   : > { %6051 = vmatprep.mubr.msk.bf16.mxu1 %vm6312_vm1, %v6311_v3  ;;  %6048 = vmatpush3.bf16.msra.mxu1 %v6103_v39  ;;  %v3203_v39 = vld [vmem:[%s6480_s20 + $0xc0] sm:$0xff] }
 0x5d3   : > { %v2727_v45 = vpack.c.bf16 %v2723_v51, %v2723_v51  ;;  %6049 = vmatprep.subr.bf16.mxu1 %v6311_v3 }
 0x5d5   : > { %6044 = vmatmul.mubr.msk.bf16.vlgmr.msra.gmra.mxu0 %vm1470_vm3, %v2727_v45 }
 0x5d6   : > { %6050 = vmatpush3.bf16.msra.mxu1 %v6104_v48  ;;  %v3180_v48 = vld [vmem:[%s6480_s20 + $0x8] sm:$0xff] }
 0x66a   : > { %v2768_v0 = vpop.f32.mrf.mxu1  ;;  %v2814_v2 = vpop.f32.mrf.mxu0 }
 0x66c   : > { %v6027_v10 = vpop.f32.mrf.mxu1  ;;  %v6033_v54 = vpop.f32.mrf.mxu0 }
 0x66e   : > { %v2771_v52 = vpop.f32.mrf.mxu1  ;;  %v2817_v57 = vpop.f32.mrf.mxu0 }
 0x670   : > { %v6028_v23 = vpop.f32.mrf.mxu1  ;;  %v6034_v31 = vpop.f32.mrf.mxu0 }
 0x691   : > { %v2860_v59 = vpop.f32.mrf.mxu1 }
 0x692   : > { %v2912_v60 = vcombine.low %v2768_v0, %v2860_v59  ;;  %v2913_v63 = vcombine.high %v2768_v0, %v2860_v59 }
 0x693   : > { %v6039_v32 = vpop.f32.mrf.mxu1 }
 0x694   : > { %v2920_v21 = vrot.slane %v2912_v60, %v6560_v37  ;;  %v2927_v14 = vrot.slane %v2913_v63, %v6560_v37 }
 0x695   : > { %v2906_v4 = vpop.f32.mrf.mxu0  ;;  %v2863_v9 = vpop.f32.mrf.mxu1 }
 0x696   : > { %v2928_v7 = vcombine.low %v2814_v2, %v2906_v4  ;;  %v2929_v8 = vcombine.high %v2814_v2, %v2906_v4 }
 0x697   : > { %v6045_v11 = vpop.f32.mrf.mxu0  ;;  %v6040_v17 = vpop.f32.mrf.mxu1 }
 0x698   : > { %v2936_v15 = vrot.slane %v2928_v7, %v6560_v37  ;;  %v2943_v16 = vrot.slane %v2929_v8, %v6560_v37  ;;  %v6273_v11 = vld [vmem:[#allocation2] sm:$0xff] }
 0x699   : > { %v2909_v18 = vpop.f32.mrf.mxu0 }
 0x69a   : > { %v2944_v20 = vcombine.low %v2920_v21, %v2936_v15  ;;  %v2945_v24 = vcombine.high %v2920_v21, %v2936_v15  ;;  %v2960_v25 = vcombine.low %v2927_v14, %v2943_v16  ;;  %v2961_v27 = vcombine.high %v2927_v14, %v2943_v16  ;;  %v6274_v18 = vld [vmem:[#allocation2 + $0x8] sm:$0xff] }
 0x69b   : > { %v6046_v28 = vpop.f32.mrf.mxu0 }
 0x69c   : > { %v2952_v26 = vrot.slane %v2944_v20, %v6563_v44  ;;  %v2959_v29 = vrot.slane %v2945_v24, %v6563_v44  ;;  %v2968_v30 = vrot.slane %v2960_v25, %v6563_v44  ;;  %v2975_v34 = vrot.slane %v2961_v27, %v6563_v44 }
 0x69e   : > { %v2980_v13 = vcombine.low %v2952_v26, %v2959_v29  ;;  %v5518_v35 = vcombine.high %v2952_v26, %v2959_v29  ;;  %v2996_v36 = vcombine.low %v2968_v30, %v2975_v34  ;;  %v5519_v38 = vcombine.high %v2968_v30, %v2975_v34 }
 0x6a0   : > { %v2987_v40 = vrot.slane %v2980_v13, %v6560_v37  ;;  %v2995_v41 = vrot.slane %v5518_v35, %v6560_v37  ;;  %v3003_v42 = vrot.slane %v2996_v36, %v6560_v37  ;;  %v3011_v19 = vrot.slane %v5519_v38, %v6560_v37  ;;  %v3195_v38 = vld [vmem:[%s6480_s20 + $0x80] sm:$0xff] }
 0x6a2   : > { %v3013_v22 = vcombine.high %v2987_v40, %v2995_v41  ;;  %v3029_v43 = vcombine.high %v3003_v42, %v3011_v19  ;;  %v3012_v46 = vcombine.low %v2987_v40, %v2995_v41  ;;  %v3028_v47 = vcombine.low %v3003_v42, %v3011_v19  ;;  %v3196_v40 = vld [vmem:[%s6480_s20 + $0x88] sm:$0xff] }
 0x6a3   : > { %v5543_v41 = vcombine.high %v3195_v38, %v3203_v39  ;;  %v3204_v42 = vld [vmem:[%s6480_s20 + $0xc8] sm:$0xff]  ;;  %v5542_v19 = vcombine.low %v3195_v38, %v3203_v39 }
 0x6a4   : > { %v3027_v49 = vrot.slane %v3013_v22, %v6563_v44  ;;  %v3043_v50 = vrot.slane %v3029_v43, %v6563_v44  ;;  %v3020_v51 = vrot.slane %v3012_v46, %v6563_v44  ;;  %v3036_v45 = vrot.slane %v3028_v47, %v6563_v44  ;;  %v3179_v46 = vld [vmem:[%s6480_s20] sm:$0xff] }
 0x6a5   : > { %v5544_v22 = vcombine.low %v3196_v40, %v3204_v42  ;;  %v5545_v43 = vcombine.high %v3196_v40, %v3204_v42  ;;  %3470 = vmatprep.subr.bf16.mxu0 %v5543_v41  ;;  %v3187_v47 = vld [vmem:[%s6480_s20 + $0x40] sm:$0xff]  ;;  %v3201_v41 = vld [vmem:[%s6480_s20 + $0xb0] sm:$0xff] }
 0x6a6   : > { %v3046_v0 = vcombine.low %v3027_v49, %v3043_v50  ;;  %v3045_v2 = vcombine.high %v3020_v51, %v3036_v45  ;;  %v3044_v37 = vcombine.low %v3020_v51, %v3036_v45  ;;  %v3047_v54 = vcombine.high %v3027_v49, %v3043_v50  ;;  %3471 = vmatpush1.bf16.msra.mxu0 %v5542_v19  ;;  %v3188_v50 = vld [vmem:[%s6480_s20 + $0x48] sm:$0xff]  ;;  %v3209_v42 = vld [vmem:[%s6480_s20 + $0xf0] sm:$0xff]  ;;  %v3202_v19 = vld [vmem:[%s6480_s20 + $0xb8] sm:$0xff] }
 0x6a7   : > { %3513 = vmatprep.subr.bf16.mxu1 %v5545_v43  ;;  %v5527_v49 = vcombine.high %v3179_v46, %v3187_v47  ;;  %v5526_v51 = vcombine.low %v3179_v46, %v3187_v47  ;;  %v5528_v45 = vcombine.low %v3180_v48, %v3188_v50  ;;  %v5555_v47 = vcombine.high %v3201_v41, %v3209_v42 }
 0x6a8   : > { %v6087_v10 = vpack.i.bf16 %v3046_v0, %v2022_v61  ;;  %v6082_v3 = vpack.i.bf16 %v3045_v2, %v2021_v6  ;;  %v6092_v44 = vpack.i.bf16 %v3047_v54, %v2023_v62  ;;  %v5529_v0 = vcombine.high %v3180_v48, %v3188_v50  ;;  %v3197_v2 = vld [vmem:[%s6480_s20 + $0x90] sm:$0xff] }
 0x6a9   : > { %3472 = vmatprep.subr.bf16.mxu0 %v5527_v49  ;;  %v3185_v49 = vld [vmem:[%s6480_s20 + $0x30] sm:$0xff] }
 0x6aa   : > { %6088 = vrot.lane.b32.xlu1 %v6087_v10, %s6318_s3  ;;  %6083 = vrot.lane.b32.xlu0 %v6082_v3, %s6319_s13  ;;  %v3198_v10 = vld [vmem:[%s6480_s20 + $0x98] sm:$0xff]  ;;  %v6321_v3 = vmov 0   ;;  %v3193_v50 = vld [vmem:[%s6480_s20 + $0x70] sm:$0xff]  ;;  %s6322_s3 = smov [#allocation2]  }
 0x6ab   : > { %3473 = vmatpush1.bf16.msra.mxu0 %v5526_v51  ;;  %3490 = vmatprep.mubr.bf16.mxu0 %v6321_v3  ;;  %v3186_v51 = vld [vmem:[%s6480_s20 + $0x38] sm:$0xff] }
 0x6ae   : > { %6093 = vrot.lane.b32.xlu0 %v6092_v44, %s6320_s2  ;;  %s5263_s2 = sshll.u32 %s6322_s3, 4  ;;  %s5264_s2 = int_to_ptr.vmem [resolvable:$true] %s5263_s2 }
 0x6af   : > { %p6282_p9 = scmp.lt.s32.totalorder %s5264_s2, %s5264_s2 }
 0x71c   : > { %v6089_v52 = vpop.permute.xlu1 %6088  ;;  %v6084_v57 = vpop.permute.xlu0 %6083 }
 0x71d   : > { %v6086_v23 = vunpack.i.h.bf16 %v6084_v57  ;;  %v6085_v61 = vunpack.i.l.bf16 %v6084_v57  ;;  %v6091_v31 = vunpack.i.h.bf16 %v6089_v52  ;;  %v6090_v59 = vunpack.i.l.bf16 %v6089_v52  ;;  %v3206_v52 = vld [vmem:[%s6480_s20 + $0xd8] sm:$0xff] }
 0x71e   : > { %v5548_v57 = vcombine.low %v3198_v10, %v3206_v52 }
 0x71f   : > { %v2036_v6 = vsel %vm1470_vm3, %v2020_v5, %v6085_v61  ;;  %v3060_v60 = vsel %vm1470_vm3, %v3044_v37, %v6086_v23  ;;  %v3205_v37 = vld [vmem:[%s6480_s20 + $0xd0] sm:$0xff]  ;;  %v5549_v23 = vcombine.high %v3198_v10, %v3206_v52  ;;  %v6105_v52 = vld [vmem:[%s6495_s17 + $0x78] sm:$0xff]  }
 0x720   : > { %v6094_v53 = vpop.permute.xlu0 %6093  ;;  %v2038_v63 = vsel %vm2037_vm5, %v2036_v6, %v6090_v59  ;;  %v3061_v32 = vsel %vm2037_vm5, %v3060_v60, %v6091_v31  ;;  %v5546_v54 = vcombine.low %v3197_v2, %v3205_v37  ;;  %v5547_v44 = vcombine.high %v3197_v2, %v3205_v37 }
 0x721   : > { %v6096_v55 = vunpack.i.h.bf16 %v6094_v53  ;;  %v6095_v62 = vunpack.i.l.bf16 %v6094_v53  ;;  %v5539_v37 = vcombine.high %v3185_v49, %v3193_v50 }
 0x722   : > { %3556 = vmatprep.subr.bf16.mxu0 %v5547_v44 }
 0x723   : > { %v2040_v4 = vsel %vm2039_vm6, %v2038_v63, %v6095_v62  ;;  %v3062_v7 = vsel %vm2039_vm6, %v3061_v32, %v6096_v55  ;;  %v5524_v63 = vld [vmem:[%s7310_s19] ss:$0 sm:$0xff] }
 0x724   : > { %v3063_v8 = vpack.c.bf16 %v3062_v7, %v2040_v4 }
 0x726   : > { %6052 = vmatmul.mubr.msk.bf16.vlgmr.msra.gmra.mxu1 %vm841_vm2, %v3063_v8  ;;  %v5525_v8 = vld [vmem:[%s7311_s22] ss:$0 sm:$0xff] }
 0x727   : > { %3514 = vmatpush1.bf16.msra.mxu1 %v5544_v22  ;;  %3533 = vmatprep.mubr.bf16.mxu1 %v6321_v3  ;;  %v3210_v22 = vld [vmem:[%s6480_s20 + $0xf8] sm:$0xff] }
 0x728   : > { %3515 = vmatprep.subr.bf16.mxu1 %v5529_v0  ;;  %v5557_v48 = vcombine.high %v3202_v19, %v3210_v22  ;;  %v5554_v0 = vcombine.low %v3201_v41, %v3209_v42  ;;  %v5556_v2 = vcombine.low %v3202_v19, %v3210_v22 }
 0x72b   : > { %3516 = vmatpush1.bf16.msra.mxu1 %v5528_v45  ;;  %v3194_v45 = vld [vmem:[%s6480_s20 + $0x78] sm:$0xff] }
 0x72c   : > { %3599 = vmatprep.subr.bf16.mxu1 %v5549_v23  ;;  %v5541_v10 = vcombine.high %v3186_v51, %v3194_v45  ;;  %v5540_v44 = vcombine.low %v3186_v51, %v3194_v45  ;;  %v6107_v23 = vld [vmem:[%s6495_s17 + $0x38] sm:$0xff]  }
 0x7e6   : > { %v3124_v58 = vpop.f32.mrf.mxu1 }
 0x7e7   : > { %v3125_v5 = vadd.f32 %v5520_v56, %v3124_v58  ;;  %v3181_v58 = vld [vmem:[%s6480_s20 + $0x10] sm:$0xff] }
 0x7e8   : > { %v6053_v9 = vpop.f32.mrf.mxu1 }
 0x7e9   : > { %v3131_v21 = vadd.f32 %v6273_v11, %v3125_v5  ;;  %v3189_v5 = vld [vmem:[%s6480_s20 + $0x50] sm:$0xff]  ;;  %v3182_v9 = vld [vmem:[%s6480_s20 + $0x18] sm:$0xff] }
 0x7ea   : > { %v3127_v14 = vpop.f32.mrf.mxu1  ;;  %v3190_v11 = vld [vmem:[%s6480_s20 + $0x58] sm:$0xff] }
 0x7eb   : > { %v3128_v15 = vadd.f32 %v5520_v56, %v3127_v14  ;;  %v3133_v16 = vsel %vm841_vm2, %v3131_v21, 0.0 }
 0x7ec   : > { %3134 = vadd.xlane.f32.xlu1 %v3133_v16  ;;  %v6054_v17 = vpop.f32.mrf.mxu1  ;;  %v5531_v16 = vcombine.high %v3181_v58, %v3189_v5 }
 0x7ed   : > { %v3132_v20 = vadd.f32 %v6274_v18, %v3128_v15  ;;  %v5533_v17 = vcombine.high %v3182_v9, %v3190_v11  ;;  %v3199_v18 = vld [vmem:[%s6480_s20 + $0xa0] sm:$0xff] }
 0x7ef   : > { %v3136_v24 = vsel %vm841_vm2, %v3132_v20, 0.0 }
 0x7f0   : > { %3137 = vadd.xlane.f32.xlu0 %v3136_v24  ;;  %v3200_v24 = vld [vmem:[%s6480_s20 + $0xa8] sm:$0xff] }
 0x875   : > { %v3135_v25 = vpop.xlane.xlu1 %3134 }
 0x876   : > { %v3140_v27 = vmul.f32 0.03125, %v3135_v25  ;;  %v3208_v25 = vld [vmem:[%s6480_s20 + $0xe8] sm:$0xff] }
 0x877   : > { %v5552_v38 = vcombine.low %v3200_v24, %v3208_v25 }
 0x878   : > { %v3142_v28 = vsub.f32 %v3131_v21, %v3140_v27  ;;  %v5530_v27 = vcombine.low %v3181_v58, %v3189_v5  ;;  %v6123_v58 = vld [vmem:[%s6495_s17 + $0x18] sm:$0xff]  }
 0x879   : > { %v3138_v26 = vpop.xlane.xlu0 %3137  ;;  %v6124_v5 = vld [vmem:[%s6495_s17 + $0x98] sm:$0xff]  }
 0x87a   : > { %v3141_v29 = vmul.f32 0.03125, %v3138_v26  ;;  %v3144_v30 = vmul.f32 %v3142_v28, %v3142_v28 }
 0x87c   : > { %v3143_v34 = vsub.f32 %v3132_v20, %v3141_v29  ;;  %v3146_v13 = vsel %vm841_vm2, %v3144_v30, 0.0  ;;  %v3207_v20 = vld [vmem:[%s6480_s20 + $0xe0] sm:$0xff]  ;;  %v5553_v29 = vcombine.high %v3200_v24, %v3208_v25  ;;  %v6132_v24 = vld [vmem:[%s6495_s17 + $0x88] sm:$0xff]  }
 0x87d   : > { %3147 = vadd.xlane.f32.xlu0 %v3146_v13  ;;  %v5551_v26 = vcombine.high %v3199_v18, %v3207_v20  ;;  %v3183_v30 = vld [vmem:[%s6480_s20 + $0x20] sm:$0xff]  ;;  %v3184_v13 = vld [vmem:[%s6480_s20 + $0x28] sm:$0xff] }
 0x87e   : > { %v3145_v35 = vmul.f32 %v3143_v34, %v3143_v34  ;;  %v6133_v25 = vld [vmem:[%s6495_s17 + $0x40] sm:$0xff]  }
 0x880   : > { %v3149_v36 = vsel %vm841_vm2, %v3145_v35, 0.0  ;;  %v3192_v35 = vld [vmem:[%s6480_s20 + $0x68] sm:$0xff] }
 0x881   : > { %3150 = vadd.xlane.f32.xlu1 %v3149_v36  ;;  %v5550_v36 = vcombine.low %v3199_v18, %v3207_v20  ;;  %v5537_v40 = vcombine.high %v3184_v13, %v3192_v35  ;;  %v5536_v46 = vcombine.low %v3184_v13, %v3192_v35  ;;  %v6130_v18 = vld [vmem:[%s6495_s17 + $0xc8] sm:$0xff]   ;;  %v3225_v13 = vsub.s32 2, %v6557_v33  ;;  %v7033_v35 = vld [vmem:[%s6485_s8] sm:$0xff] }
 0x882   : > { %v6131_v20 = vld [vmem:[%s6495_s17 + $0x8] sm:$0xff]   ;;  %v3218_v41 = vrot.slane %v7033_v35, %v6625_v12 }
 0x883   : > { %v3226_v42 = vrot.slane %v7033_v35, %v3225_v13 }
 0x906   : > { %v3148_v61 = vpop.xlane.xlu0 %3147 }
 0x907   : > { %v3152_v31 = vmul.f32 0.03125, %v3148_v61  ;;  %v6108_v61 = vld [vmem:[%s6495_s17 + $0xb8] sm:$0xff]  }
 0x909   : > { %v3154_v59 = vadd.f32 1e-05, %v3152_v31  ;;  %v6109_v31 = vld [vmem:[%s6495_s17 + $0x70] sm:$0xff]  }
 0x90a   : > { %v3151_v6 = vpop.xlane.xlu1 %3150 }
 0x90b   : > { %6265 = vrsqrt.f32 %v3154_v59  ;;  %v3153_v60 = vmul.f32 0.03125, %v3151_v6  ;;  %v6110_v59 = vld [vmem:[%s6495_s17 + $0xf0] sm:$0xff]  }
 0x90c   : > { %v6112_v6 = vld [vmem:[%s6495_s17 + $0xb0] sm:$0xff]  }
 0x90d   : > { %v3155_v53 = vadd.f32 1e-05, %v3153_v60  ;;  %v6113_v60 = vld [vmem:[%s6495_s17 + $0x68] sm:$0xff]  }
 0x90f   : > { %6267 = vrsqrt.f32 %v3155_v53  ;;  %v6114_v53 = vld [vmem:[%s6495_s17 + $0xe8] sm:$0xff]  }
 0x918   : > { %v6266_v55 = vpop.eup %6265 }
 0x919   : > { %v3158_v62 = vmul.f32 %v6266_v55, %v3142_v28  ;;  %v5532_v28 = vcombine.low %v3182_v9, %v3190_v11  ;;  %v6115_v55 = vld [vmem:[%s6495_s17 + $0x28] sm:$0xff]   ;;  %v6125_v9 = vld [vmem:[%s6495_s17 + $0x50] sm:$0xff]  }
 0x91a   : > { %v6126_v11 = vld [vmem:[%s6495_s17 + $0xd0] sm:$0xff]  }
 0x91b   : > { %v3167_v4 = vmul.f32 %v5524_v63, %v3158_v62  ;;  %v6116_v62 = vld [vmem:[%s6495_s17 + $0xa8] sm:$0xff]  }
 0x91c   : > { %v6268_v32 = vpop.eup %6267 }
 0x91d   : > { %v3159_v7 = vmul.f32 %v6268_v32, %v3143_v34  ;;  %v6950_v21 = vadd.f32 %v5525_v8, %v3167_v4  ;;  %v3191_v34 = vld [vmem:[%s6480_s20 + $0x60] sm:$0xff] }
 0x91e   : > { %v5535_v39 = vcombine.high %v3183_v30, %v3191_v34  ;;  %v5534_v43 = vcombine.low %v3183_v30, %v3191_v34  ;;  %v6118_v32 = vld [vmem:[%s6495_s17 + $0xe0] sm:$0xff]   ;;  %v6138_v30 = vld [vmem:[%s6495_s17 + $0x1f8] sm:$0xff]   ;;  %v3229_v34 = vsub.s32 3, %v6557_v33 }
 0x91f   : > { %v3168_v56 = vmul.f32 %v5524_v63, %v3159_v7  ;;  %v6117_v63 = vld [vmem:[%s6495_s17 + $0x60] sm:$0xff]  }
 0x920   : > { %v6119_v4 = vld [vmem:[%s6495_s17 + $0x20] sm:$0xff]  }
 0x921   : > { %v6952_v14 = vadd.f32 %v5525_v8, %v3168_v56  ;;  %v6120_v7 = vld [vmem:[%s6495_s17 + $0xa0] sm:$0xff]   ;;  %v6121_v8 = vld [vmem:[%s6495_s17 + $0x58] sm:$0xff]  }
 0x922   : > { %v6122_v56 = vld [vmem:[%s6495_s17 + $0xd8] sm:$0xff]  }
 0x923   : > { %v6956_v15 = vpack.c.bf16 %v6952_v14, %v6950_v21 }
 0x925   : > { %5558 = vmatmul.mubr.msk.bf16.vlgmr.msra.gmra.mxu0 %vm841_vm2, %v6956_v15  ;;  %5559 = vmatmul.mubr.msk.bf16.vlgmr.msra.gmra.mxu1 %vm841_vm2, %v6956_v15 }
 0x926   : > { %3557 = vmatpush1.bf16.msra.mxu0 %v5546_v54  ;;  %3600 = vmatpush1.bf16.msra.mxu1 %v5548_v57  ;;  %v5538_v54 = vcombine.low %v3185_v49, %v3193_v50  ;;  %v6106_v57 = vld [vmem:[%s6495_s17 + $0xf8] sm:$0xff]  }
 0x927   : > { %3558 = vmatprep.subr.bf16.mxu0 %v5531_v16  ;;  %3601 = vmatprep.subr.bf16.mxu1 %v5533_v17  ;;  %v6128_v16 = vld [vmem:[%s6495_s17 + $0x90] sm:$0xff]   ;;  %v6129_v17 = vld [vmem:[%s6495_s17 + $0x48] sm:$0xff]  }
 0x928   : > { %3576 = vmatprep.mubr.bf16.mxu0 %v6321_v3  ;;  %3619 = vmatprep.mubr.bf16.mxu1 %v6321_v3 }
 0x92a   : > { %3559 = vmatpush1.bf16.msra.mxu0 %v5530_v27  ;;  %3602 = vmatpush1.bf16.msra.mxu1 %v5532_v28  ;;  %v6134_v27 = vld [vmem:[%s6495_s17 + $0xc0] sm:$0xff]  }
 0x92b   : > { %3642 = vmatprep.subr.bf16.mxu0 %v5551_v26  ;;  %3685 = vmatprep.subr.bf16.mxu1 %v5553_v29  ;;  %v6135_v28 = vld [vmem:[%s6495_s17] sm:$0xff]   ;;  %v6137_v29 = vld [vmem:[%s6495_s17 + $0x178] sm:$0xff]  }
 0x92c   : > { %v6136_v26 = vld [vmem:[%s6495_s17 + $0x80] sm:$0xff]  }
 0x92d   : > { %5560 = vmatmul.mubr.msk.bf16.vlgmr.msra.gmra.mxu0 %vm841_vm2, %v6956_v15  ;;  %5561 = vmatmul.mubr.msk.bf16.vlgmr.msra.gmra.mxu1 %vm841_vm2, %v6956_v15 }
 0x92e   : > { %3643 = vmatpush1.bf16.msra.mxu0 %v5550_v36  ;;  %3686 = vmatpush1.bf16.msra.mxu1 %v5552_v38 }
 0x92f   : > { %3644 = vmatprep.subr.bf16.mxu0 %v5535_v39  ;;  %3687 = vmatprep.subr.bf16.mxu1 %v5537_v40  ;;  %v3222_v39 = vrot.slane %v7033_v35, %v6777_v1  ;;  %v3230_v40 = vrot.slane %v7033_v35, %v3229_v34 }
 0x930   : > { %3662 = vmatprep.mubr.bf16.mxu0 %v6321_v3  ;;  %3705 = vmatprep.mubr.bf16.mxu1 %v6321_v3 }
 0x932   : > { %3645 = vmatpush1.bf16.msra.mxu0 %v5534_v43  ;;  %3688 = vmatpush1.bf16.msra.mxu1 %v5536_v46 }
 0x933   : > { %3728 = vmatprep.subr.bf16.mxu0 %v5555_v47  ;;  %3771 = vmatprep.subr.bf16.mxu1 %v5557_v48  ;;  %v3237_v47 = vsub.s32 5, %v6557_v33  ;;  %v3245_v48 = vsub.s32 7, %v6557_v33 }
 0x935   : > { %5562 = vmatmul.mubr.msk.bf16.vlgmr.msra.gmra.mxu0 %vm841_vm2, %v6956_v15  ;;  %5563 = vmatmul.mubr.msk.bf16.vlgmr.msra.gmra.mxu1 %vm841_vm2, %v6956_v15 }
 0x936   : > { %3729 = vmatpush1.bf16.msra.mxu0 %v5554_v0  ;;  %3772 = vmatpush1.bf16.msra.mxu1 %v5556_v2 }
 0x937   : > { %3730 = vmatprep.subr.bf16.mxu0 %v5539_v37  ;;  %3773 = vmatprep.subr.bf16.mxu1 %v5541_v10 }
 0x938   : > { %3748 = vmatprep.mubr.bf16.mxu0 %v6321_v3  ;;  %3791 = vmatprep.mubr.bf16.mxu1 %v6321_v3  ;;  %v6111_v3 = vld [vmem:[%s6495_s17 + $0x30] sm:$0xff]  }
 0x93a   : > { %3731 = vmatpush1.bf16.msra.mxu0 %v5538_v54  ;;  %3774 = vmatpush1.bf16.msra.mxu1 %v5540_v44 }
 0x93b   : > { %5751 = vmatprep.subr.bf16.mxu0 %v6105_v52  ;;  %5773 = vmatprep.subr.bf16.mxu1 %v6106_v57 }
 0x93d   : > { %5564 = vmatmul.mubr.msk.bf16.vlgmr.msra.gmra.mxu0 %vm841_vm2, %v6956_v15  ;;  %5565 = vmatmul.mubr.msk.bf16.vlgmr.msra.gmra.mxu1 %vm841_vm2, %v6956_v15  ;;  %v6127_v15 = vld [vmem:[%s6495_s17 + $0x10] sm:$0xff]  }
 0x93e   : > { %5752 = vmatpush3.bf16.msra.mxu0 %v6107_v23  ;;  %5774 = vmatpush3.bf16.msra.mxu1 %v6108_v61 }
 0x93f   : > { %5753 = vmatprep.subr.bf16.mxu0 %v6109_v31  ;;  %5775 = vmatprep.subr.bf16.mxu1 %v6110_v59  ;;  %v3238_v31 = vrot.slane %v7033_v35, %v3237_v47  ;;  %v3246_v59 = vrot.slane %v7033_v35, %v3245_v48 }
 0x942   : > { %5754 = vmatpush3.bf16.msra.mxu0 %v6111_v3  ;;  %5776 = vmatpush3.bf16.msra.mxu1 %v6112_v6 }
 0x943   : > { %5755 = vmatprep.subr.bf16.mxu0 %v6113_v60  ;;  %5777 = vmatprep.subr.bf16.mxu1 %v6114_v53 }
 0x946   : > { %5756 = vmatpush3.bf16.msra.mxu0 %v6115_v55  ;;  %5778 = vmatpush3.bf16.msra.mxu1 %v6116_v62 }
 0x947   : > { %5757 = vmatprep.subr.bf16.mxu0 %v6117_v63  ;;  %5779 = vmatprep.subr.bf16.mxu1 %v6118_v32 }
 0x94a   : > { %5758 = vmatpush3.bf16.msra.mxu0 %v6119_v4  ;;  %5780 = vmatpush3.bf16.msra.mxu1 %v6120_v7 }
 0x94b   : > { %5759 = vmatprep.subr.bf16.mxu0 %v6121_v8  ;;  %5781 = vmatprep.subr.bf16.mxu1 %v6122_v56  ;;  %v6139_v8 = vld [vmem:[%s6495_s17 + $0x138] sm:$0xff]  }
 0x94c   : > { %v6140_v56 = vld [vmem:[%s6495_s17 + $0x1b8] sm:$0xff]  }
 0x94e   : > { %5760 = vmatpush3.bf16.msra.mxu0 %v6123_v58  ;;  %5782 = vmatpush3.bf16.msra.mxu1 %v6124_v5 }
 0x94f   : > { %5761 = vmatprep.subr.bf16.mxu0 %v6125_v9  ;;  %5783 = vmatprep.subr.bf16.mxu1 %v6126_v11 }
 0x952   : > { %5762 = vmatpush3.bf16.msra.mxu0 %v6127_v15  ;;  %5784 = vmatpush3.bf16.msra.mxu1 %v6128_v16  ;;  %v6141_v15 = vld [vmem:[%s6495_s17 + $0x170] sm:$0xff]  }
 0x953   : > { %5763 = vmatprep.subr.bf16.mxu0 %v6129_v17  ;;  %5785 = vmatprep.subr.bf16.mxu1 %v6130_v18  ;;  %v6142_v16 = vld [vmem:[%s6495_s17 + $0x1f0] sm:$0xff]  }
 0x956   : > { %5764 = vmatpush3.bf16.msra.mxu0 %v6131_v20  ;;  %5786 = vmatpush3.bf16.msra.mxu1 %v6132_v24 }
 0x957   : > { %5765 = vmatprep.subr.bf16.mxu0 %v6133_v25  ;;  %5787 = vmatprep.subr.bf16.mxu1 %v6134_v27 }
 0x95a   : > { %5766 = vmatpush3.bf16.msra.mxu0 %v6135_v28  ;;  %5788 = vmatpush3.bf16.msra.mxu1 %v6136_v26  ;;  %v6143_v28 = vld [vmem:[%s6495_s17 + $0x130] sm:$0xff]  }
 0x95b   : > { %5795 = vmatprep.subr.bf16.mxu0 %v6137_v29  ;;  %5817 = vmatprep.subr.bf16.mxu1 %v6138_v30  ;;  %v6144_v26 = vld [vmem:[%s6495_s17 + $0x1b0] sm:$0xff]   ;;  %v6145_v29 = vld [vmem:[%s6495_s17 + $0x168] sm:$0xff]  }
 0x9e5   : > { %v3492_v36 = vpop.f32.mrf.mxu0  ;;  %v3535_v38 = vpop.f32.mrf.mxu1 }
 0x9e6   : > { %v3493_v0 = vadd.f32 %v3492_v36, %v3218_v41  ;;  %v3536_v2 = vadd.f32 %v3535_v38, %v3226_v42 }
 0x9e7   : > { %v3494_v19 = vpop.f32.mrf.mxu0  ;;  %v3537_v22 = vpop.f32.mrf.mxu1 }
 0x9e8   : > { %v3495_v49 = vadd.f32 %v3494_v19, %v3222_v39  ;;  %v3538_v50 = vadd.f32 %v3537_v22, %v3230_v40  ;;  %v3802_v55 = vmax.f32 %v3493_v0, 0.0  ;;  %v3804_v62 = vmax.f32 %v3536_v2, 0.0  ;;  %v6147_v19 = vld [vmem:[%s6495_s17 + $0x128] sm:$0xff]   ;;  %v6153_v0 = vld [vmem:[%s6495_s17 + $0x158] sm:$0xff]  }
 0x9e9   : > { %v3496_v43 = vpop.f32.mrf.mxu0  ;;  %v3539_v46 = vpop.f32.mrf.mxu1  ;;  %v6148_v22 = vld [vmem:[%s6495_s17 + $0x1a8] sm:$0xff]   ;;  %v6154_v2 = vld [vmem:[%s6495_s17 + $0x1d8] sm:$0xff]  }
 0x9ea   : > { %v3497_v51 = vadd.f32 %v3496_v43, %v3218_v41  ;;  %v3540_v45 = vadd.f32 %v3539_v46, %v3226_v42  ;;  %v3803_v3 = vmax.f32 %v3495_v49, 0.0  ;;  %v3805_v6 = vmax.f32 %v3538_v50, 0.0  ;;  %v6149_v43 = vld [vmem:[%s6495_s17 + $0x160] sm:$0xff]  }
 0x9eb   : > { %v3498_v37 = vpop.f32.mrf.mxu0  ;;  %v3541_v10 = vpop.f32.mrf.mxu1  ;;  %v6150_v46 = vld [vmem:[%s6495_s17 + $0x1e0] sm:$0xff]  }
 0x9ec   : > { %v3499_v54 = vadd.f32 %v3498_v37, %v3222_v39  ;;  %v3542_v44 = vadd.f32 %v3541_v10, %v3230_v40  ;;  %v3818_v52 = vmax.f32 %v3497_v51, 0.0  ;;  %v3820_v57 = vmax.f32 %v3540_v45, 0.0  ;;  %v6146_v40 = vld [vmem:[%s6495_s17 + $0x1e8] sm:$0xff]   ;;  %v6151_v50 = vld [vmem:[%s6495_s17 + $0x120] sm:$0xff]   ;;  %v6155_v10 = vld [vmem:[%s6495_s17 + $0x118] sm:$0xff]  }
 0x9ed   : > { %v7047_v23 = vpop.f32.mrf.mxu0  ;;  %v7049_v61 = vpop.f32.mrf.mxu1  ;;  %v6152_v45 = vld [vmem:[%s6495_s17 + $0x1a0] sm:$0xff]  }
 0x9ee   : > { %v3819_v60 = vmax.f32 %v3499_v54, 0.0  ;;  %v3821_v53 = vmax.f32 %v3542_v44, 0.0  ;;  %v3834_v58 = vpack.c.bf16 %v3818_v52, %v3802_v55  ;;  %v3836_v5 = vpack.c.bf16 %v3820_v57, %v3804_v62  ;;  %v6156_v44 = vld [vmem:[%s6495_s17 + $0x198] sm:$0xff]   ;;  %v6157_v52 = vld [vmem:[%s6495_s17 + $0x150] sm:$0xff]   ;;  %v6161_v55 = vld [vmem:[%s6495_s17 + $0x148] sm:$0xff]  }
 0x9ef   : > { %v3580_v63 = vpop.f32.mrf.mxu0  ;;  %v3623_v32 = vpop.f32.mrf.mxu1  ;;  %v6158_v57 = vld [vmem:[%s6495_s17 + $0x1d0] sm:$0xff]   ;;  %v6162_v62 = vld [vmem:[%s6495_s17 + $0x1c8] sm:$0xff]  }
 0x9f0   : > { %v3835_v4 = vpack.c.bf16 %v3819_v60, %v3803_v3  ;;  %v3837_v7 = vpack.c.bf16 %v3821_v53, %v3805_v6  ;;  %v3581_v17 = vadd.f32 %v3580_v63, %v3238_v31  ;;  %v3624_v18 = vadd.f32 %v3623_v32, %v3246_v59  ;;  %v6159_v6 = vld [vmem:[%s6495_s17 + $0x110] sm:$0xff]  }
 0x9f1   : > { %v7059_v9 = vpop.f32.mrf.mxu0  ;;  %v7061_v11 = vpop.f32.mrf.mxu1  ;;  %v6160_v53 = vld [vmem:[%s6495_s17 + $0x190] sm:$0xff]  }
 0x9f2   : > { %4913 = vmatprep.mubr.bf16.mxu0 %v3835_v4  ;;  %4954 = vmatprep.mubr.bf16.mxu1 %v3837_v7  ;;  %v3807_v30 = vmax.f32 %v3581_v17, 0.0  ;;  %v3809_v36 = vmax.f32 %v3624_v18, 0.0  ;;  %v7102_v4 = vld [vmem:[%s6485_s8 + $0x8] sm:$0xff]  ;;  %v6166_v18 = vld [vmem:[%s6495_s17 + $0x1c0] sm:$0xff]  }
 0x9f3   : > { %v3584_v20 = vpop.f32.mrf.mxu0  ;;  %v3627_v24 = vpop.f32.mrf.mxu1  ;;  %4914 = vmatmul.mubr.bf16.vlgmr.msra.gmra.mxu0 %v3834_v58  ;;  %4955 = vmatmul.mubr.bf16.vlgmr.msra.gmra.mxu1 %v3836_v5  ;;  %v3254_v58 = vrot.slane %v7102_v4, %v6777_v1  ;;  %v3262_v17 = vrot.slane %v7102_v4, %v3229_v34 }
 0x9f4   : > { %v3585_v25 = vadd.f32 %v3584_v20, %v3238_v31  ;;  %v3628_v27 = vadd.f32 %v3627_v24, %v3246_v59  ;;  %5796 = vmatpush3.bf16.msra.mxu0 %v6139_v8  ;;  %5818 = vmatpush3.bf16.msra.mxu1 %v6140_v56  ;;  %v3233_v31 = vsub.s32 4, %v6557_v33  ;;  %v3241_v59 = vsub.s32 6, %v6557_v33  ;;  %v6163_v8 = vld [vmem:[%s6495_s17 + $0x108] sm:$0xff]   ;;  %v6231_v33 = vld [vmem:[%s6495_s17 + $0x300] sm:$0xff]  }
 0x9f5   : > { %5797 = vmatprep.subr.bf16.mxu0 %v6141_v15  ;;  %5819 = vmatprep.subr.bf16.mxu1 %v6142_v16  ;;  %v7073_v49 = vpop.f32.mrf.mxu0  ;;  %v7076_v51 = vpop.f32.mrf.mxu1  ;;  %v6164_v15 = vld [vmem:[%s6495_s17 + $0x188] sm:$0xff]   ;;  %v6165_v16 = vld [vmem:[%s6495_s17 + $0x140] sm:$0xff]  }
 0x9f6   : > { %v3823_v38 = vmax.f32 %v3585_v25, 0.0  ;;  %v3825_v39 = vmax.f32 %v3628_v27, 0.0  ;;  %v3234_v63 = vrot.slane %v7033_v35, %v3233_v31  ;;  %v3242_v32 = vrot.slane %v7033_v35, %v3241_v59  ;;  %v6167_v25 = vld [vmem:[%s6495_s17 + $0x100] sm:$0xff]  }
 0x9f7   : > { %v3666_v37 = vpop.f32.mrf.mxu0  ;;  %v3709_v54 = vpop.f32.mrf.mxu1 }
 0x9f8   : > { %v3839_v41 = vpack.c.bf16 %v3823_v38, %v3807_v30  ;;  %v3841_v42 = vpack.c.bf16 %v3825_v39, %v3809_v36  ;;  %5798 = vmatpush3.bf16.msra.mxu0 %v6143_v28  ;;  %5820 = vmatpush3.bf16.msra.mxu1 %v6144_v26  ;;  %v3583_v56 = vadd.f32 %v7059_v9, %v3234_v63  ;;  %v6169_v26 = vld [vmem:[%s6495_s17 + $0x278] sm:$0xff]  }
 0x9f9   : > { %5799 = vmatprep.subr.bf16.mxu0 %v6145_v29  ;;  %5821 = vmatprep.subr.bf16.mxu1 %v6146_v40  ;;  %v7087_v3 = vpop.f32.mrf.mxu0  ;;  %v7090_v60 = vpop.f32.mrf.mxu1  ;;  %v3626_v35 = vadd.f32 %v7061_v11, %v3242_v32  ;;  %v3579_v9 = vadd.f32 %v7047_v23, %v3234_v63  ;;  %v3622_v1 = vadd.f32 %v7049_v61, %v3242_v32  ;;  %v6168_v11 = vld [vmem:[%s6495_s17 + $0x180] sm:$0xff]   ;;  %v6170_v30 = vld [vmem:[%s6495_s17 + $0x2f8] sm:$0xff]  }
 0x9fa   : > { %4995 = vmatprep.mubr.bf16.mxu0 %v3839_v41  ;;  %5036 = vmatprep.mubr.bf16.mxu1 %v3841_v42  ;;  %v3822_v27 = vmax.f32 %v3583_v56, 0.0  ;;  %v3667_v28 = vadd.f32 %v3666_v37, %v3254_v58  ;;  %v3710_v29 = vadd.f32 %v3709_v54, %v3262_v17  ;;  %v6171_v39 = vld [vmem:[%s6495_s17 + $0x238] sm:$0xff]   ;;  %v6177_v37 = vld [vmem:[%s6495_s17 + $0x268] sm:$0xff]  }
 0x9fb   : > { %v3670_v7 = vpop.f32.mrf.mxu0  ;;  %v3713_v5 = vpop.f32.mrf.mxu1  ;;  %v3824_v34 = vmax.f32 %v3626_v35, 0.0  ;;  %v3806_v23 = vmax.f32 %v3579_v9, 0.0  ;;  %v3808_v61 = vmax.f32 %v3622_v1, 0.0  ;;  %v6172_v42 = vld [vmem:[%s6495_s17 + $0x2b8] sm:$0xff]   ;;  %v6179_v54 = vld [vmem:[%s6495_s17 + $0x228] sm:$0xff]   ;;  %v6191_v35 = vld [vmem:[%s6495_s17 + $0x210] sm:$0xff]   ;;  %v3250_v1 = vrot.slane %v7102_v4, %v6625_v12 }
 0x9fc   : > { %5800 = vmatpush3.bf16.msra.mxu0 %v6147_v19  ;;  %5822 = vmatpush3.bf16.msra.mxu1 %v6148_v22  ;;  %v3671_v20 = vadd.f32 %v3670_v7, %v3254_v58  ;;  %v3714_v24 = vadd.f32 %v3713_v5, %v3262_v17  ;;  %v3811_v41 = vmax.f32 %v3667_v28, 0.0  ;;  %v3813_v22 = vmax.f32 %v3710_v29, 0.0  ;;  %v6185_v63 = vld [vmem:[%s6495_s17 + $0x258] sm:$0xff]   ;;  %v6189_v5 = vld [vmem:[%s6495_s17 + $0x250] sm:$0xff]   ;;  %v6193_v9 = vld [vmem:[%s6495_s17 + $0x248] sm:$0xff]  }
 0x9fd   : > { %5801 = vmatprep.subr.bf16.mxu0 %v6149_v43  ;;  %5823 = vmatprep.subr.bf16.mxu1 %v6150_v46  ;;  %v3838_v40 = vpack.c.bf16 %v3822_v27, %v3806_v23  ;;  %v3840_v19 = vpack.c.bf16 %v3824_v34, %v3808_v61  ;;  %v6173_v43 = vld [vmem:[%s6495_s17 + $0x270] sm:$0xff]   ;;  %v6186_v32 = vld [vmem:[%s6495_s17 + $0x2d8] sm:$0xff]   ;;  %v6195_v27 = vld [vmem:[%s6495_s17 + $0x208] sm:$0xff]   ;;  %v3669_v28 = vadd.f32 %v7087_v3, %v3250_v1 }
 0x9fe   : > { %v3827_v36 = vmax.f32 %v3671_v20, 0.0  ;;  %v3829_v38 = vmax.f32 %v3714_v24, 0.0  ;;  %v6188_v58 = vld [vmem:[%s6495_s17 + $0x298] sm:$0xff]   ;;  %v6194_v20 = vld [vmem:[%s6495_s17 + $0x2c8] sm:$0xff]   ;;  %v3258_v24 = vrot.slane %v7102_v4, %v3225_v13  ;;  %v6197_v12 = vld [vmem:[%s6495_s17 + $0x240] sm:$0xff]   ;;  %v3278_v13 = vrot.slane %v7102_v4, %v3245_v48 }
 0x9ff   : > { %v6196_v34 = vld [vmem:[%s6495_s17 + $0x288] sm:$0xff]   ;;  %v6198_v3 = vld [vmem:[%s6495_s17 + $0x2c0] sm:$0xff]  }
 0xa00   : > { %5802 = vmatpush3.bf16.msra.mxu0 %v6151_v50  ;;  %5824 = vmatpush3.bf16.msra.mxu1 %v6152_v45  ;;  %v3843_v46 = vpack.c.bf16 %v3827_v36, %v3811_v41  ;;  %v6174_v50 = vld [vmem:[%s6495_s17 + $0x2f0] sm:$0xff]   ;;  %v3845_v45 = vpack.c.bf16 %v3829_v38, %v3813_v22  ;;  %v3712_v29 = vadd.f32 %v7090_v60, %v3258_v24  ;;  %v6199_v61 = vld [vmem:[%s6495_s17 + $0x200] sm:$0xff]   ;;  %v3826_v38 = vmax.f32 %v3669_v28, 0.0 }
 0xa01   : > { %5803 = vmatprep.subr.bf16.mxu0 %v6153_v0  ;;  %5825 = vmatprep.subr.bf16.mxu1 %v6154_v2  ;;  %v6175_v0 = vld [vmem:[%s6495_s17 + $0x230] sm:$0xff]   ;;  %v6200_v60 = vld [vmem:[%s6495_s17 + $0x280] sm:$0xff]   ;;  %v3266_v28 = vrot.slane %v7102_v4, %v3233_v31 }
 0xa02   : > { %v6176_v2 = vld [vmem:[%s6495_s17 + $0x2b0] sm:$0xff]   ;;  %v3828_v48 = vmax.f32 %v3712_v29, 0.0  ;;  %v6229_v29 = vld [vmem:[%s6495_s17 + $0x340] sm:$0xff]  }
 0xa04   : > { %5804 = vmatpush3.bf16.msra.mxu0 %v6155_v10  ;;  %5826 = vmatpush3.bf16.msra.mxu1 %v6156_v44  ;;  %v6178_v10 = vld [vmem:[%s6495_s17 + $0x2e8] sm:$0xff]  }
 0xa05   : > { %5805 = vmatprep.subr.bf16.mxu0 %v6157_v52  ;;  %5827 = vmatprep.subr.bf16.mxu1 %v6158_v57  ;;  %v6180_v44 = vld [vmem:[%s6495_s17 + $0x2a8] sm:$0xff]   ;;  %v6181_v52 = vld [vmem:[%s6495_s17 + $0x260] sm:$0xff]  }
 0xa06   : > { %v6182_v57 = vld [vmem:[%s6495_s17 + $0x2e0] sm:$0xff]  }
 0xa08   : > { %5806 = vmatpush3.bf16.msra.mxu0 %v6159_v6  ;;  %5828 = vmatpush3.bf16.msra.mxu1 %v6160_v53  ;;  %v7133_v6 = vpop.f32.mrf.mxu0  ;;  %v6183_v53 = vld [vmem:[%s6495_s17 + $0x220] sm:$0xff]  }
 0xa09   : > { %5807 = vmatprep.subr.bf16.mxu0 %v6161_v55  ;;  %5829 = vmatprep.subr.bf16.mxu1 %v6162_v62  ;;  %v7136_v55 = vpop.f32.mrf.mxu1  ;;  %v6184_v62 = vld [vmem:[%s6495_s17 + $0x2a0] sm:$0xff]  }
 0xa0a   : > { %v3752_v7 = vpop.f32.mrf.mxu0 }
 0xa0b   : > { %v3795_v56 = vpop.f32.mrf.mxu1 }
 0xa0c   : > { %5808 = vmatpush3.bf16.msra.mxu0 %v6163_v8  ;;  %5830 = vmatpush3.bf16.msra.mxu1 %v6164_v15  ;;  %v6187_v8 = vld [vmem:[%s6495_s17 + $0x218] sm:$0xff]   ;;  %v6190_v15 = vld [vmem:[%s6495_s17 + $0x2d0] sm:$0xff]   ;;  %v3796_v41 = vadd.f32 %v3795_v56, %v3278_v13  ;;  %v6215_v56 = vld [vmem:[%s6495_s17 + $0x320] sm:$0xff]  }
 0xa0d   : > { %5809 = vmatprep.subr.bf16.mxu0 %v6165_v16  ;;  %5831 = vmatprep.subr.bf16.mxu1 %v6166_v18  ;;  %v7145_v16 = vpop.f32.mrf.mxu0  ;;  %v7148_v17 = vpop.f32.mrf.mxu1  ;;  %v6192_v18 = vld [vmem:[%s6495_s17 + $0x290] sm:$0xff]  }
 0xa10   : > { %5810 = vmatpush3.bf16.msra.mxu0 %v6167_v25  ;;  %5832 = vmatpush3.bf16.msra.mxu1 %v6168_v11  ;;  %v3756_v25 = vpop.f32.mrf.mxu0  ;;  %v3270_v11 = vrot.slane %v7102_v4, %v3237_v47  ;;  %v3708_v47 = vadd.f32 %v7076_v51, %v3258_v24  ;;  %v6224_v24 = vld [vmem:[%s6495_s17 + $0x390] sm:$0xff]  }
 0xa11   : > { %5839 = vmatprep.subr.bf16.mxu0 %v6169_v26  ;;  %5861 = vmatprep.subr.bf16.mxu1 %v6170_v30  ;;  %v3799_v26 = vpop.f32.mrf.mxu1  ;;  %v3665_v30 = vadd.f32 %v7073_v49, %v3250_v1  ;;  %v6223_v1 = vld [vmem:[%s6495_s17 + $0x310] sm:$0xff]  }
 0xa12   : > { %v3757_v23 = vadd.f32 %v3756_v25, %v3270_v11  ;;  %v3800_v36 = vadd.f32 %v3799_v26, %v3278_v13  ;;  %v3812_v51 = vmax.f32 %v3708_v47, 0.0  ;;  %v6225_v25 = vld [vmem:[%s6495_s17 + $0x348] sm:$0xff]  }
 0xa13   : > { %4996 = vmatmul.mubr.bf16.vlgmr.msra.gmra.mxu0 %v3838_v40  ;;  %5037 = vmatmul.mubr.bf16.vlgmr.msra.gmra.mxu1 %v3840_v19  ;;  %v6201_v40 = vld [vmem:[%s6495_s17 + $0x378] sm:$0xff]   ;;  %v3810_v49 = vmax.f32 %v3665_v30, 0.0  ;;  %v6227_v26 = vld [vmem:[%s6495_s17 + $0x308] sm:$0xff]   ;;  %v3751_v30 = vadd.f32 %v7133_v6, %v3266_v28 }
 0xa14   : > { %5840 = vmatpush3.bf16.msra.mxu0 %v6171_v39  ;;  %5077 = vmatprep.mubr.bf16.mxu0 %v3843_v46  ;;  %v3753_v39 = vadd.f32 %v3752_v7, %v3270_v11  ;;  %v3831_v19 = vmax.f32 %v3757_v23, 0.0  ;;  %v3833_v22 = vmax.f32 %v3800_v36, 0.0  ;;  %v6213_v7 = vld [vmem:[%s6495_s17 + $0x360] sm:$0xff]   ;;  %v3274_v11 = vrot.slane %v7102_v4, %v3241_v59 }
 0xa15   : > { %5862 = vmatpush3.bf16.msra.mxu1 %v6172_v42  ;;  %5118 = vmatprep.mubr.bf16.mxu1 %v3845_v45  ;;  %v6202_v42 = vld [vmem:[%s6495_s17 + $0x3f8] sm:$0xff]   ;;  %v3842_v46 = vpack.c.bf16 %v3826_v38, %v3810_v49  ;;  %v6232_v4 = vld [vmem:[%s6495_s17 + $0x380] sm:$0xff]  }
 0xa16   : > { %5841 = vmatprep.subr.bf16.mxu0 %v6173_v43  ;;  %5863 = vmatprep.subr.bf16.mxu1 %v6174_v50  ;;  %v6203_v43 = vld [vmem:[%s6495_s17 + $0x338] sm:$0xff]   ;;  %v3815_v50 = vmax.f32 %v3753_v39, 0.0  ;;  %v3798_v13 = vadd.f32 %v7148_v17, %v3274_v11  ;;  %v3794_v31 = vadd.f32 %v7136_v55, %v3274_v11 }
 0xa17   : > { %v6204_v45 = vld [vmem:[%s6495_s17 + $0x3b8] sm:$0xff]  }
 0xa18   : > { %5842 = vmatpush3.bf16.msra.mxu0 %v6175_v0  ;;  %v3844_v0 = vpack.c.bf16 %v3828_v48, %v3812_v51  ;;  %v3832_v23 = vmax.f32 %v3798_v13, 0.0  ;;  %v3816_v47 = vmax.f32 %v3794_v31, 0.0 }
 0xa19   : > { %5864 = vmatpush3.bf16.msra.mxu1 %v6176_v2  ;;  %5843 = vmatprep.subr.bf16.mxu0 %v6177_v37  ;;  %v3817_v2 = vmax.f32 %v3796_v41, 0.0  ;;  %v6205_v37 = vld [vmem:[%s6495_s17 + $0x370] sm:$0xff]  }
 0xa1a   : > { %5865 = vmatprep.subr.bf16.mxu1 %v6178_v10  ;;  %v3847_v10 = vpack.c.bf16 %v3831_v19, %v3815_v50  ;;  %v3848_v17 = vpack.c.bf16 %v3832_v23, %v3816_v47  ;;  %v5566_v50 = vld [vmem:[%s798_s27] ss:$0 sm:$0xff]  ;;  %s7312_s27 = sld [smem:[#allocation6_spill]] }
 0xa1c   : > { %5844 = vmatpush3.bf16.msra.mxu0 %v6179_v54  ;;  %v6206_v54 = vld [vmem:[%s6495_s17 + $0x3f0] sm:$0xff]  }
 0xa1d   : > { %5866 = vmatpush3.bf16.msra.mxu1 %v6180_v44  ;;  %5845 = vmatprep.subr.bf16.mxu0 %v6181_v52  ;;  %v3849_v44 = vpack.c.bf16 %v3833_v22, %v3817_v2  ;;  %v6207_v52 = vld [vmem:[%s6495_s17 + $0x330] sm:$0xff]  }
 0xa1e   : > { %5867 = vmatprep.subr.bf16.mxu1 %v6182_v57  ;;  %v6208_v57 = vld [vmem:[%s6495_s17 + $0x3b0] sm:$0xff]  }
 0xa20   : > { %5846 = vmatpush3.bf16.msra.mxu0 %v6183_v53  ;;  %v6209_v53 = vld [vmem:[%s6495_s17 + $0x368] sm:$0xff]   ;;  %p6059_p5 = scmp.eq.s32.totalorder %s7312_s27, 1 }
 0xa21   : > { %5868 = vmatpush3.bf16.msra.mxu1 %v6184_v62  ;;  %5847 = vmatprep.subr.bf16.mxu0 %v6185_v63  ;;  %v6210_v62 = vld [vmem:[%s6495_s17 + $0x3e8] sm:$0xff]  }
 0xa22   : > { %5869 = vmatprep.subr.bf16.mxu1 %v6186_v32  ;;  %v6211_v63 = vld [vmem:[%s6495_s17 + $0x328] sm:$0xff]  }
 0xa23   : > { %v6212_v32 = vld [vmem:[%s6495_s17 + $0x3a8] sm:$0xff]  }
 0xa24   : > { %5848 = vmatpush3.bf16.msra.mxu0 %v6187_v8  ;;  %v6214_v8 = vld [vmem:[%s6495_s17 + $0x3e0] sm:$0xff]  }
 0xa25   : > { %5870 = vmatpush3.bf16.msra.mxu1 %v6188_v58  ;;  %5849 = vmatprep.subr.bf16.mxu0 %v6189_v5  ;;  %v6216_v58 = vld [vmem:[%s6495_s17 + $0x3a0] sm:$0xff]   ;;  %v6217_v5 = vld [vmem:[%s6495_s17 + $0x358] sm:$0xff]  }
 0xa26   : > { %5871 = vmatprep.subr.bf16.mxu1 %v6190_v15  ;;  %v6218_v15 = vld [vmem:[%s6495_s17 + $0x3d8] sm:$0xff]  }
 0xa28   : > { %5850 = vmatpush3.bf16.msra.mxu0 %v6191_v35  ;;  %v6219_v35 = vld [vmem:[%s6495_s17 + $0x318] sm:$0xff]  }
 0xa29   : > { %5872 = vmatpush3.bf16.msra.mxu1 %v6192_v18  ;;  %5851 = vmatprep.subr.bf16.mxu0 %v6193_v9  ;;  %v6220_v18 = vld [vmem:[%s6495_s17 + $0x398] sm:$0xff]   ;;  %v6221_v9 = vld [vmem:[%s6495_s17 + $0x350] sm:$0xff]  }
 0xa2a   : > { %5873 = vmatprep.subr.bf16.mxu1 %v6194_v20  ;;  %v6222_v20 = vld [vmem:[%s6495_s17 + $0x3d0] sm:$0xff]  }
 0xa2c   : > { %5852 = vmatpush3.bf16.msra.mxu0 %v6195_v27  ;;  %v6226_v27 = vld [vmem:[%s6495_s17 + $0x3c8] sm:$0xff]  }
 0xa2d   : > { %5874 = vmatpush3.bf16.msra.mxu1 %v6196_v34  ;;  %5853 = vmatprep.subr.bf16.mxu0 %v6197_v12  ;;  %v3755_v34 = vadd.f32 %v7145_v16, %v3266_v28  ;;  %v6228_v12 = vld [vmem:[%s6495_s17 + $0x388] sm:$0xff]   ;;  %v3814_v16 = vmax.f32 %v3751_v30, 0.0 }
 0xa2e   : > { %5875 = vmatprep.subr.bf16.mxu1 %v6198_v3  ;;  %v6230_v3 = vld [vmem:[%s6495_s17 + $0x3c0] sm:$0xff]  }
 0xa2f   : > { %v3830_v59 = vmax.f32 %v3755_v34, 0.0 }
 0xa30   : > { %5854 = vmatpush3.bf16.msra.mxu0 %v6199_v61 }
 0xa31   : > { %5876 = vmatpush3.bf16.msra.mxu1 %v6200_v60  ;;  %5883 = vmatprep.subr.bf16.mxu0 %v6201_v40  ;;  %v3846_v36 = vpack.c.bf16 %v3830_v59, %v3814_v16 }
 0xa32   : > { %5905 = vmatprep.subr.bf16.mxu1 %v6202_v42 }
 0xa33   : > { %5078 = vmatmul.mubr.bf16.vlgmr.msra.gmra.mxu0 %v3842_v46 }
 0xa34   : > { %5119 = vmatmul.mubr.bf16.vlgmr.msra.gmra.mxu1 %v3844_v0  ;;  %5884 = vmatpush3.bf16.msra.mxu0 %v6203_v43 }
 0xa35   : > { %5159 = vmatprep.mubr.bf16.mxu0 %v3847_v10  ;;  %5906 = vmatpush3.bf16.msra.mxu1 %v6204_v45 }
 0xa36   : > { %5200 = vmatprep.mubr.bf16.mxu1 %v3849_v44  ;;  %5885 = vmatprep.subr.bf16.mxu0 %v6205_v37 }
 0xa37   : > { %5907 = vmatprep.subr.bf16.mxu1 %v6206_v54 }
 0xa38   : > { %5886 = vmatpush3.bf16.msra.mxu0 %v6207_v52 }
 0xa39   : > { %5908 = vmatpush3.bf16.msra.mxu1 %v6208_v57  ;;  %5887 = vmatprep.subr.bf16.mxu0 %v6209_v53 }
 0xa3a   : > { %5909 = vmatprep.subr.bf16.mxu1 %v6210_v62 }
 0xa3c   : > { %5888 = vmatpush3.bf16.msra.mxu0 %v6211_v63 }
 0xa3d   : > { %5910 = vmatpush3.bf16.msra.mxu1 %v6212_v32  ;;  %5889 = vmatprep.subr.bf16.mxu0 %v6213_v7 }
 0xa3e   : > { %5911 = vmatprep.subr.bf16.mxu1 %v6214_v8 }
 0xa40   : > { %5890 = vmatpush3.bf16.msra.mxu0 %v6215_v56 }
 0xa41   : > { %5912 = vmatpush3.bf16.msra.mxu1 %v6216_v58  ;;  %5891 = vmatprep.subr.bf16.mxu0 %v6217_v5 }
 0xa42   : > { %5913 = vmatprep.subr.bf16.mxu1 %v6218_v15 }
 0xa44   : > { %5892 = vmatpush3.bf16.msra.mxu0 %v6219_v35 }
 0xa45   : > { %5914 = vmatpush3.bf16.msra.mxu1 %v6220_v18  ;;  %5893 = vmatprep.subr.bf16.mxu0 %v6221_v9 }
 0xa46   : > { %5915 = vmatprep.subr.bf16.mxu1 %v6222_v20 }
 0xa48   : > { %5894 = vmatpush3.bf16.msra.mxu0 %v6223_v1 }
 0xa49   : > { %5916 = vmatpush3.bf16.msra.mxu1 %v6224_v24  ;;  %5895 = vmatprep.subr.bf16.mxu0 %v6225_v25 }
 0xa4a   : > { %5917 = vmatprep.subr.bf16.mxu1 %v6226_v27 }
 0xa4c   : > { %5896 = vmatpush3.bf16.msra.mxu0 %v6227_v26 }
 0xa4d   : > { %5918 = vmatpush3.bf16.msra.mxu1 %v6228_v12  ;;  %5897 = vmatprep.subr.bf16.mxu0 %v6229_v29 }
 0xa4e   : > { %5919 = vmatprep.subr.bf16.mxu1 %v6230_v3 }
 0xa50   : > { %5898 = vmatpush3.bf16.msra.mxu0 %v6231_v33 }
 0xa51   : > { %5920 = vmatpush3.bf16.msra.mxu1 %v6232_v4 }
 0xa53   : > { %5160 = vmatmul.mubr.bf16.vlgmr.msra.gmra.mxu0 %v3846_v36 }
 0xa54   : > { %5201 = vmatmul.mubr.bf16.vlgmr.msra.gmra.mxu1 %v3848_v17 }
 0xab3   : > { %v5767_v61 = vpop.f32.mrf.mxu0  ;;  %v5789_v6 = vpop.f32.mrf.mxu1 }
 0xab5   : > { %v5768_v55 = vpop.f32.mrf.mxu0  ;;  %v5790_v38 = vpop.f32.mrf.mxu1 }
 0xab6   : > { %v5769_v46 = vadd.f32 %v5768_v55, %v5767_v61  ;;  %v5791_v44 = vadd.f32 %v5790_v38, %v5789_v6 }
 0xab7   : > { %v5770_v39 = vpop.f32.mrf.mxu0  ;;  %v5792_v60 = vpop.f32.mrf.mxu1 }
 0xab8   : > { %v4916_v2 = vadd.f32 %v5769_v46, %v5566_v50 }
 0xab9   : > { %v5771_v40 = vpop.f32.mrf.mxu0  ;;  %v5793_v41 = vpop.f32.mrf.mxu1 }
 0xaba   : > { %v5772_v37 = vadd.f32 %v5771_v40, %v5770_v39  ;;  %v4957_v57 = vadd.f32 %v5791_v44, %v4916_v2  ;;  %v5794_v32 = vadd.f32 %v5793_v41, %v5792_v60 }
 0xabc   : > { %v4919_v53 = vadd.f32 %v5772_v37, %v5566_v50 }
 0xabe   : > { %v4960_v56 = vadd.f32 %v5794_v32, %v4919_v53 }
 0xad3   : > { %v5811_v48 = vpop.f32.mrf.mxu0  ;;  %v5833_v42 = vpop.f32.mrf.mxu1 }
 0xad5   : > { %v5812_v49 = vpop.f32.mrf.mxu0  ;;  %v5834_v19 = vpop.f32.mrf.mxu1 }
 0xad6   : > { %v5813_v52 = vadd.f32 %v5812_v49, %v5811_v48  ;;  %v5835_v58 = vadd.f32 %v5834_v19, %v5833_v42 }
 0xad7   : > { %v5814_v51 = vpop.f32.mrf.mxu0  ;;  %v5836_v22 = vpop.f32.mrf.mxu1 }
 0xad8   : > { %v4998_v7 = vadd.f32 %v5813_v52, %v4957_v57  ;;  %v5696_v52 = vld [vmem:[%s804_s21] ss:$0 sm:$0xff] }
 0xad9   : > { %v5815_v43 = vpop.f32.mrf.mxu0  ;;  %v5837_v0 = vpop.f32.mrf.mxu1 }
 0xada   : > { %v5816_v8 = vadd.f32 %v5815_v43, %v5814_v51  ;;  %v5039_v18 = vadd.f32 %v5835_v58, %v4998_v7  ;;  %v5838_v20 = vadd.f32 %v5837_v0, %v5836_v22 }
 0xadc   : > { %v5001_v9 = vadd.f32 %v5816_v8, %v4960_v56 }
 0xade   : > { %v5042_v28 = vadd.f32 %v5838_v20, %v5001_v9 }
 0xaf3   : > { %v5855_v45 = vpop.f32.mrf.mxu0 }
 0xaf4   : > { %v5877_v10 = vpop.f32.mrf.mxu1 }
 0xaf5   : > { %v5856_v54 = vpop.f32.mrf.mxu0 }
 0xaf6   : > { %v5878_v62 = vpop.f32.mrf.mxu1  ;;  %v5857_v5 = vadd.f32 %v5856_v54, %v5855_v45  ;;  %v5695_v54 = vld [vmem:[%s801_s5] ss:$0 sm:$0xff]  ;;  %s6275_s5 = scalar_lea.vmem %s5264_s2, 256 }
 0xaf7   : > { %v5858_v63 = vpop.f32.mrf.mxu0  ;;  %v5879_v11 = vadd.f32 %v5878_v62, %v5877_v10  ;;  %p6276_p6 = scmp.ne.s32.totalorder %s5264_s2, %s6275_s5  ;;  %p6283_p10 = scmp.lt.s32.totalorder %s6275_s5, %s6275_s5 }
 0xaf8   : > { %v5880_v15 = vpop.f32.mrf.mxu1  ;;  %v5080_v1 = vadd.f32 %v5857_v5, %v5039_v18 }
 0xaf9   : > { %v5859_v35 = vpop.f32.mrf.mxu0  ;;  %p6277_p7 = pnand %p6276_p6, %p6059_p5  ;;  %p6284_p11 = por %p6283_p10, %p6282_p9 }
 0xafa   : > { %v5860_v24 = vadd.f32 %v5859_v35, %v5858_v63  ;;  %v5881_v25 = vpop.f32.mrf.mxu1  ;;  %v5121_v12 = vadd.f32 %v5879_v11, %v5080_v1 }
 0xafb   : > { %v5882_v31 = vadd.f32 %v5881_v25, %v5880_v15  ;;  %p6278_p8 = pneg %p6277_p7 }
 0xafc   : > { %v5083_v29 = vadd.f32 %v5860_v24, %v5042_v28 }
 0xafd   : > { %p6285_p12 = pnand %p6284_p11, %p6278_p8 }
 0xafe   : > { %v5124_v16 = vadd.f32 %v5882_v31, %v5083_v29 }
 0xb13   : > { %v5899_v27 = vpop.f32.mrf.mxu0 }
 0xb14   : > { %v5921_v26 = vpop.f32.mrf.mxu1 }
 0xb15   : > { %v5900_v34 = vpop.f32.mrf.mxu0 }
 0xb16   : > { %v5901_v13 = vadd.f32 %v5900_v34, %v5899_v27  ;;  %v5922_v3 = vpop.f32.mrf.mxu1 }
 0xb17   : > { %v5902_v30 = vpop.f32.mrf.mxu0  ;;  %v5923_v59 = vadd.f32 %v5922_v3, %v5921_v26 }
 0xb18   : > { %v5162_v33 = vadd.f32 %v5901_v13, %v5121_v12  ;;  %v5924_v4 = vpop.f32.mrf.mxu1 }
 0xb19   : > { %v5903_v23 = vpop.f32.mrf.mxu0 }
 0xb1a   : > { %v5203_v47 = vadd.f32 %v5923_v59, %v5162_v33  ;;  %v5904_v36 = vadd.f32 %v5903_v23, %v5902_v30  ;;  %v5925_v17 = vpop.f32.mrf.mxu1 }
 0xb1b   : > { %v5926_v6 = vadd.f32 %v5925_v17, %v5924_v4 }
 0xb1c   : > { %v5165_v61 = vadd.f32 %v5904_v36, %v5124_v16  ;;  %v5209_v55 = vadd.f32 %v5203_v47, %v6950_v21 }
 0xb1e   : > { %v5206_v38 = vadd.f32 %v5926_v6, %v5165_v61  ;;  %v5211_v39 = vsel %vm841_vm2, %v5209_v55, 0.0 }
 0xb1f   : > { %5212 = vadd.xlane.f32.xlu0 %v5211_v39 }
 0xb20   : > { %v5210_v60 = vadd.f32 %v5206_v38, %v6952_v14 }
 0xb22   : > { %v5214_v40 = vsel %vm841_vm2, %v5210_v60, 0.0 }
 0xb23   : > { %5215 = vadd.xlane.f32.xlu1 %v5214_v40 }
 0xba8   : > { %v5213_v48 = vpop.xlane.xlu0 %5212 }
 0xba9   : > { %v5217_v41 = vmul.f32 0.03125, %v5213_v48 }
 0xbab   : > { %v5219_v42 = vsub.f32 %v5209_v55, %v5217_v41 }
 0xbac   : > { %v5216_v49 = vpop.xlane.xlu1 %5215 }
 0xbad   : > { %v5218_v19 = vmul.f32 0.03125, %v5216_v49  ;;  %v5221_v51 = vmul.f32 %v5219_v42, %v5219_v42 }
 0xbaf   : > { %v5220_v22 = vsub.f32 %v5210_v60, %v5218_v19  ;;  %v5223_v43 = vsel %vm841_vm2, %v5221_v51, 0.0 }
 0xbb0   : > { %5224 = vadd.xlane.f32.xlu0 %v5223_v43 }
 0xbb1   : > { %v5222_v21 = vmul.f32 %v5220_v22, %v5220_v22 }
 0xbb3   : > { %v5226_v46 = vsel %vm841_vm2, %v5222_v21, 0.0 }
 0xbb4   : > { %5227 = vadd.xlane.f32.xlu1 %v5226_v46 }
 0xc39   : > { %v5225_v14 = vpop.xlane.xlu0 %5224 }
 0xc3a   : > { %v5229_v50 = vmul.f32 0.03125, %v5225_v14 }
 0xc3c   : > { %v5231_v45 = vadd.f32 1e-05, %v5229_v50 }
 0xc3d   : > { %v5228_v0 = vpop.xlane.xlu1 %5227 }
 0xc3e   : > { %6269 = vrsqrt.f32 %v5231_v45  ;;  %v5230_v2 = vmul.f32 0.03125, %v5228_v0 }
 0xc40   : > { %v5232_v37 = vadd.f32 1e-05, %v5230_v2 }
 0xc42   : > { %6271 = vrsqrt.f32 %v5232_v37 }
 0xc4b   : > { %v6270_v10 = vpop.eup %6269 }
 0xc4c   : > { %v5235_v44 = vmul.f32 %v6270_v10, %v5219_v42 }
 0xc4e   : > { %v5244_v57 = vmul.f32 %v5695_v54, %v5235_v44 }
 0xc4f   : > { %v6272_v53 = vpop.eup %6271 }
 0xc50   : > { %v5236_v62 = vmul.f32 %v6272_v53, %v5220_v22  ;;  %v5253_v63 = vadd.f32 %v5696_v52, %v5244_v57 }
 0xc52   : > { %v5245_v32 = vmul.f32 %v5695_v54, %v5236_v62  ;;  %5255 = vst.msk [vmem:[#allocation2] sm:$0xff] %vm841_vm2, %v5253_v63 }
 0xc54   : > { %v5254_v7 = vadd.f32 %v5696_v52, %v5245_v32 }
 0xc56   : > { %5256 = vst.msk [vmem:[#allocation2 + $0x8] sm:$0xff] %vm841_vm2, %v5254_v7 }
 0xc57   : > { %6288 = shalt.err (!%p6285_p12)
}
 0xc58   : > { %s6323_s29 = smov 128   ;;  %s7314_s23 = sld [smem:[#allocation18_spill]] }
 0xc5e   : > { %6056 = dma.vmem_to_hbm [thread:$0]  (%p6059_p5), %s5264_s2, 256, %s7314_s23, [#allocation3], %s6323_s29, %s6323_s29, %s6319_s13  }
 0xc5f   : > { %6304 = dma.done.wait (%p6059_p5), [#allocation3], 256  }
 0xc60   : > { %6306 = vsyncadd (%p6059_p5), [#allocation3], 4294967040 }
 0xc61 PF: > { %s7315_s26 = sld [smem:[#allocation5_spill]] }
 0xc67   : > { %s29_s27 = sadd.s32 1, %s7315_s26  }
 0xc68   : > { %p26_p13 = scmp.ge.s32.totalorder %s29_s27, 4  }
 0xc6a   :  { %28 = sbr.rel (!%p26_p13) target bundleno = 14 (0xe), region = 168 }
 0xc6f   :  { %5279 = vsyncpa [#allocation3], 1 }
 0xc70   :  { %5281 = vsyncpa [#allocation3 + $0x1], 1 }

</bundles_post_ra>
